<compile_context>
chip_gen: v6e
topology: v6e:2x2x1
jax: 0.10.0
libtpu: 0.0.40
codegen_flags: <defaults>
</compile_context>

<pallas_src>
import numpy as np

import jax
import jax.numpy as jnp
from jax.experimental import pallas as pl
from jax.experimental.pallas import tpu as pltpu


def _round_up(v, m):
    return -(-v // m) * m


# ----------------------------------------------------------------------------
# Row-stacked 0/1 "tap selector" matrix for one conv layer.
# E[t*m_pad + i*Wo + j, r*w + c] = 1  iff conv-output position (i, j) at kernel
# tap t = (kh, kw) reads input pixel (r, c).  Rows hitting zero-padding (and
# rows added to pad Ho*Wo up to m_pad) stay all-zero, so stride + padding are
# fully encoded and the kernel never needs strided slices or an HBM im2col.
# ----------------------------------------------------------------------------
def _conv_tap_selector_cat(h, w, k, stride, pad, in_rows, m_pad):
    ho = (h + 2 * pad - k) // stride + 1
    wo = (w + 2 * pad - k) // stride + 1
    assert ho * wo <= m_pad and h * w <= in_rows
    E = np.zeros((k * k * m_pad, in_rows), np.float32)
    for kh in range(k):
        for kw in range(k):
            t = kh * k + kw
            for i in range(ho):
                r = stride * i + kh - pad
                if not (0 <= r < h):
                    continue
                for j in range(wo):
                    c = stride * j + kw - pad
                    if 0 <= c < w:
                        E[t * m_pad + i * wo + j, r * w + c] = 1.0
    return E, ho, wo


# ----------------------------------------------------------------------------
# Fused kernel: whole conv(+ReLU) stack, whole batch, one invocation.
# refs = (x, E_1..E_L, W_1..W_L, b_1..b_L, out)
#   x   : (H*W, B*C0)            bf16, lanes = (batch, channel)
#   E_i : (k^2*Mi_pad, prev_rows) bf16, row-stacked 0/1 tap selectors
#   W_i : (k^2, B*Cin, B*Cout)    bf16, per-tap batch-block-diagonal weights
#   b_i : (1, B*Cout)             f32 bias row (tiled per batch)
# ----------------------------------------------------------------------------
def _make_fused_kernel(num_layers):
    def kernel(*refs):
        x_ref = refs[0]
        e_refs = refs[1:1 + num_layers]
        w_refs = refs[1 + num_layers:1 + 2 * num_layers]
        b_refs = refs[1 + 2 * num_layers:1 + 3 * num_layers]
        o_ref = refs[1 + 3 * num_layers]

        x = x_ref[...]                                  # (rows, B*Cin) bf16
        act = None
        for e_ref, w_ref, b_ref in zip(e_refs, w_refs, b_refs):
            taps = w_ref.shape[0]
            m_pad = e_ref.shape[0] // taps

            # Stage 1: ALL k*k taps in ONE bf16 MXU matmul (f32 accumulation).
            y = jnp.dot(e_ref[...], x, preferred_element_type=jnp.float32)
            # Selector rows are one-hot/zero, so the bf16 round-trip is exact.
            y = y.astype(jnp.bfloat16)                  # (k^2*m_pad, B*Cin)

            # Stage 2: per-tap weight matmul on sublane-aligned static slices,
            # accumulated in f32 (unrolled at trace time).
            acc = None
            for t in range(taps):
                yt = y[t * m_pad:(t + 1) * m_pad, :]
                z = jnp.dot(yt, w_ref[t], preferred_element_type=jnp.float32)
                acc = z if acc is None else acc + z

            act = jnp.maximum(acc + b_ref[...], 0.0)    # bias + ReLU in f32
            x = act.astype(jnp.bfloat16)                # next layer's bf16 input
        o_ref[...] = act                                # f32, lane/sublane-dense
    return kernel


# ----------------------------------------------------------------------------
# Encoder: deterministic params + fused sequential forward (NCHW boundary)
# ----------------------------------------------------------------------------
class EncoderPallas:
    # cfg: list of (out_channels, kernel, stride, padding)
    def __init__(self, cfg, start_channel=3, is_linear=False, seed=42):
        self.cfg = cfg
        self.is_linear = is_linear
        # TODO(synk): generic `pars_model` config parsing (Linear/BatchNorm/...)
        # is not reproduced; this instantiates the default conv(+ReLU) stack.
        key = jax.random.PRNGKey(seed)
        self.params = []
        cin = start_channel
        for (cout, k, stride, pad) in cfg:
            key, kw_key, kb_key = jax.random.split(key, 3)
            fan_in = cin * k * k
            w = jax.random.normal(kw_key, (cout, cin, k, k), jnp.float32)
            w = w * (2.0 / fan_in) ** 0.5
            b = 0.01 * jax.random.normal(kb_key, (cout,), jnp.float32)
            self.params.append((w, b, stride, pad))
            cin = cout
        self._cache = {}

    def _build_forward(self, x_shape):
        B, C0, H, W = x_shape
        n_layers = len(self.params)

        e_list, w_list, b_list = [], [], []
        h, w_sp, cin = H, W, C0
        in_rows = H * W
        for li, (wt, bias, stride, pad) in enumerate(self.params):
            cout, cin_w, k, _ = wt.shape
            assert cin_w == cin
            ho = (h + 2 * pad - k) // stride + 1
            wo = (w_sp + 2 * pad - k) // stride + 1
            m_pad = _round_up(ho * wo, 8)               # sublane-dense rows
            E, ho, wo = _conv_tap_selector_cat(h, w_sp, k, stride, pad,
                                               in_rows, m_pad)

            last = (li == n_layers - 1)
            # Lane-dense final store: pad B*Cout of the LAST layer up to 128.
            n_cols = _round_up(B * cout, 128) if last else B * cout

            # Per-tap weights, block-diagonal over batch:
            # rows ordered (b, ci), cols ordered (b, co).
            w_np = np.asarray(wt)                       # (Cout, Cin, KH, KW)
            Wt = np.zeros((k * k, B * cin, n_cols), np.float32)
            for kh in range(k):
                for kw in range(k):
                    t = kh * k + kw
                    wm = w_np[:, :, kh, kw].T           # (Cin, Cout)
                    for bb in range(B):
                        Wt[t, bb * cin:(bb + 1) * cin,
                              bb * cout:(bb + 1) * cout] = wm
            b_np = np.asarray(bias)
            brow = np.zeros((1, n_cols), np.float32)
            for bb in range(B):
                brow[0, bb * cout:(bb + 1) * cout] = b_np

            e_list.append(jnp.asarray(E, dtype=jnp.bfloat16))
            w_list.append(jnp.asarray(Wt, dtype=jnp.bfloat16))
            b_list.append(jnp.asarray(brow, dtype=jnp.float32))

            h, w_sp, cin, in_rows = ho, wo, cout, m_pad

        h_last, w_last = h, w_sp
        m_last = h_last * w_last
        cout_last = self.params[-1][0].shape[0]
        out_rows = in_rows                               # last layer's m_pad
        out_cols = b_list[-1].shape[1]                   # padded B*Cout (>=128)

        consts = [*e_list, *w_list, *b_list]

        # Advisory cost estimate for XLA's scheduler.
        flops = 0
        for e, ws in zip(e_list, w_list):
            rows, cols = e.shape
            taps, kdim, ndim_ = ws.shape
            flops += 2 * rows * cols * kdim              # selector stage
            flops += 2 * rows * kdim * ndim_             # weight stage
        bytes_accessed = H * W * B * C0 * 2 + out_rows * out_cols * 4
        bytes_accessed += sum(int(a.size) * a.dtype.itemsize for a in consts)

        fused = pl.pallas_call(
            _make_fused_kernel(n_layers),
            out_shape=jax.ShapeDtypeStruct((out_rows, out_cols), jnp.float32),
            compiler_params=pltpu.CompilerParams(
                vmem_limit_bytes=32 * 1024 * 1024),
            cost_estimate=pl.CostEstimate(flops=int(flops), transcendentals=0,
                                          bytes_accessed=int(bytes_accessed)),
        )

        def fwd(x_nchw):
            # NCHW -> rows = (h, w), lanes = (batch, channel); batch in lanes.
            xt = jnp.transpose(x_nchw, (2, 3, 0, 1)).reshape(H * W, B * C0)
            out = fused(xt.astype(jnp.bfloat16), *consts)
            out = out[:m_last, :B * cout_last].reshape(h_last, w_last, B,
                                                       cout_last)
            return jnp.transpose(out, (2, 3, 0, 1))      # -> NCHW

        return jax.jit(fwd)

    def __call__(self, x_nchw):
        if self.is_linear:
            # TODO(synk): linear-cfg encoder path not instantiated here.
            x_nchw = x_nchw.reshape(x_nchw.shape[0], -1)
        key = tuple(x_nchw.shape)
        if key not in self._cache:
            self._cache[key] = self._build_forward(x_nchw.shape)
        return self._cache[key](x_nchw)


# ----------------------------------------------------------------------------
# Pure-JAX reference (f32) for correctness check
# ----------------------------------------------------------------------------
def encoder_ref(x_nchw, params):
    x = x_nchw
    for (w, b, stride, pad) in params:
        x = jax.lax.conv_general_dilated(
            x, w, (stride, stride), [(pad, pad), (pad, pad)],
            dimension_numbers=("NCHW", "OIHW", "NCHW"))
        x = jnp.maximum(x + b.reshape(1, -1, 1, 1), 0.0)
    return x


if __name__ == "__main__":
    cfg = [(8, 3, 2, 1), (16, 3, 2, 1), (32, 3, 2, 1)]
    enc = EncoderPallas(cfg, start_channel=3, is_linear=False, seed=42)

    x = jax.random.normal(jax.random.PRNGKey(0), (2, 3, 16, 16), jnp.float32)

    y = jax.block_until_ready(enc(x))
    y_ref = jax.block_until_ready(encoder_ref(x, enc.params))

    assert y.shape == (2, 32, 2, 2), y.shape
    # bf16 operands (f32 accumulation) -> loosened tolerance vs. f32 reference.
    max_err = float(jnp.max(jnp.abs(y - y_ref)))
    assert jnp.allclose(y, y_ref, rtol=5e-2, atol=5e-2), max_err

    print("KERNEL_OK")
</pallas_src>

<mosaic_0001>
module attributes {stable_mosaic.version = 11 : i64} {
  func.func @kernel(%arg0: memref<256x6xbf16, #tpu.memory_space<vmem>>, %arg1: memref<576x256xbf16, #tpu.memory_space<vmem>>, %arg2: memref<144x64xbf16, #tpu.memory_space<vmem>>, %arg3: memref<72x16xbf16, #tpu.memory_space<vmem>>, %arg4: memref<9x6x16xbf16, #tpu.memory_space<vmem>>, %arg5: memref<9x16x32xbf16, #tpu.memory_space<vmem>>, %arg6: memref<9x32x128xbf16, #tpu.memory_space<vmem>>, %arg7: memref<1x16xf32, #tpu.memory_space<vmem>>, %arg8: memref<1x32xf32, #tpu.memory_space<vmem>>, %arg9: memref<1x128xf32, #tpu.memory_space<vmem>>, %arg10: memref<8x128xf32, #tpu.memory_space<vmem>>) attributes {dimension_semantics = [], scalar_prefetch = 0 : i64, scratch_operands = 0 : i64, tpu.core_type = #tpu.core_type<tc>} {
    %c0 = arith.constant 0 : index
    %c0_0 = arith.constant 0 : index
    %0 = vector.load %arg0[%c0, %c0_0] : memref<256x6xbf16, #tpu.memory_space<vmem>>, vector<256x6xbf16>
    %c0_1 = arith.constant 0 : index
    %c0_2 = arith.constant 0 : index
    %1 = vector.load %arg1[%c0_1, %c0_2] : memref<576x256xbf16, #tpu.memory_space<vmem>>, vector<576x256xbf16>
    %cst = arith.constant dense<0.000000e+00> : vector<576x6xf32>
    %2 = tpu.matmul %1, %0, %cst {dimension_numbers = #tpu.dot_dimension_numbers<[1], [0], [0], [1], [0, 0, 1, 1], [], []>} : vector<576x256xbf16>, vector<256x6xbf16>, vector<576x6xf32> -> vector<576x6xf32>
    %3 = arith.truncf %2 : vector<576x6xf32> to vector<576x6xbf16>
    %4 = vector.extract_strided_slice %3 {offsets = [0, 0], sizes = [64, 6], strides = [1, 1]} : vector<576x6xbf16> to vector<64x6xbf16>
    %c0_3 = arith.constant 0 : index
    %c0_4 = arith.constant 0 : index
    %c0_5 = arith.constant 0 : index
    %5 = vector.load %arg4[%c0_3, %c0_4, %c0_5] : memref<9x6x16xbf16, #tpu.memory_space<vmem>>, vector<1x6x16xbf16>
    %6 = vector.shape_cast %5 : vector<1x6x16xbf16> to vector<6x16xbf16>
    %cst_6 = arith.constant dense<0.000000e+00> : vector<64x16xf32>
    %7 = tpu.matmul %4, %6, %cst_6 {dimension_numbers = #tpu.dot_dimension_numbers<[1], [0], [0], [1], [0, 0, 1, 1], [], []>} : vector<64x6xbf16>, vector<6x16xbf16>, vector<64x16xf32> -> vector<64x16xf32>
    %8 = vector.extract_strided_slice %3 {offsets = [64, 0], sizes = [64, 6], strides = [1, 1]} : vector<576x6xbf16> to vector<64x6xbf16>
    %c1 = arith.constant 1 : index
    %c0_7 = arith.constant 0 : index
    %c0_8 = arith.constant 0 : index
    %9 = vector.load %arg4[%c1, %c0_7, %c0_8] : memref<9x6x16xbf16, #tpu.memory_space<vmem>>, vector<1x6x16xbf16>
    %10 = vector.shape_cast %9 : vector<1x6x16xbf16> to vector<6x16xbf16>
    %cst_9 = arith.constant dense<0.000000e+00> : vector<64x16xf32>
    %11 = tpu.matmul %8, %10, %cst_9 {dimension_numbers = #tpu.dot_dimension_numbers<[1], [0], [0], [1], [0, 0, 1, 1], [], []>} : vector<64x6xbf16>, vector<6x16xbf16>, vector<64x16xf32> -> vector<64x16xf32>
    %12 = arith.addf %7, %11 : vector<64x16xf32>
    %13 = vector.extract_strided_slice %3 {offsets = [128, 0], sizes = [64, 6], strides = [1, 1]} : vector<576x6xbf16> to vector<64x6xbf16>
    %c2 = arith.constant 2 : index
    %c0_10 = arith.constant 0 : index
    %c0_11 = arith.constant 0 : index
    %14 = vector.load %arg4[%c2, %c0_10, %c0_11] : memref<9x6x16xbf16, #tpu.memory_space<vmem>>, vector<1x6x16xbf16>
    %15 = vector.shape_cast %14 : vector<1x6x16xbf16> to vector<6x16xbf16>
    %cst_12 = arith.constant dense<0.000000e+00> : vector<64x16xf32>
    %16 = tpu.matmul %13, %15, %cst_12 {dimension_numbers = #tpu.dot_dimension_numbers<[1], [0], [0], [1], [0, 0, 1, 1], [], []>} : vector<64x6xbf16>, vector<6x16xbf16>, vector<64x16xf32> -> vector<64x16xf32>
    %17 = arith.addf %12, %16 : vector<64x16xf32>
    %18 = vector.extract_strided_slice %3 {offsets = [192, 0], sizes = [64, 6], strides = [1, 1]} : vector<576x6xbf16> to vector<64x6xbf16>
    %c3 = arith.constant 3 : index
    %c0_13 = arith.constant 0 : index
    %c0_14 = arith.constant 0 : index
    %19 = vector.load %arg4[%c3, %c0_13, %c0_14] : memref<9x6x16xbf16, #tpu.memory_space<vmem>>, vector<1x6x16xbf16>
    %20 = vector.shape_cast %19 : vector<1x6x16xbf16> to vector<6x16xbf16>
    %cst_15 = arith.constant dense<0.000000e+00> : vector<64x16xf32>
    %21 = tpu.matmul %18, %20, %cst_15 {dimension_numbers = #tpu.dot_dimension_numbers<[1], [0], [0], [1], [0, 0, 1, 1], [], []>} : vector<64x6xbf16>, vector<6x16xbf16>, vector<64x16xf32> -> vector<64x16xf32>
    %22 = arith.addf %17, %21 : vector<64x16xf32>
    %23 = vector.extract_strided_slice %3 {offsets = [256, 0], sizes = [64, 6], strides = [1, 1]} : vector<576x6xbf16> to vector<64x6xbf16>
    %c4 = arith.constant 4 : index
    %c0_16 = arith.constant 0 : index
    %c0_17 = arith.constant 0 : index
    %24 = vector.load %arg4[%c4, %c0_16, %c0_17] : memref<9x6x16xbf16, #tpu.memory_space<vmem>>, vector<1x6x16xbf16>
    %25 = vector.shape_cast %24 : vector<1x6x16xbf16> to vector<6x16xbf16>
    %cst_18 = arith.constant dense<0.000000e+00> : vector<64x16xf32>
    %26 = tpu.matmul %23, %25, %cst_18 {dimension_numbers = #tpu.dot_dimension_numbers<[1], [0], [0], [1], [0, 0, 1, 1], [], []>} : vector<64x6xbf16>, vector<6x16xbf16>, vector<64x16xf32> -> vector<64x16xf32>
    %27 = arith.addf %22, %26 : vector<64x16xf32>
    %28 = vector.extract_strided_slice %3 {offsets = [320, 0], sizes = [64, 6], strides = [1, 1]} : vector<576x6xbf16> to vector<64x6xbf16>
    %c5 = arith.constant 5 : index
    %c0_19 = arith.constant 0 : index
    %c0_20 = arith.constant 0 : index
    %29 = vector.load %arg4[%c5, %c0_19, %c0_20] : memref<9x6x16xbf16, #tpu.memory_space<vmem>>, vector<1x6x16xbf16>
    %30 = vector.shape_cast %29 : vector<1x6x16xbf16> to vector<6x16xbf16>
    %cst_21 = arith.constant dense<0.000000e+00> : vector<64x16xf32>
    %31 = tpu.matmul %28, %30, %cst_21 {dimension_numbers = #tpu.dot_dimension_numbers<[1], [0], [0], [1], [0, 0, 1, 1], [], []>} : vector<64x6xbf16>, vector<6x16xbf16>, vector<64x16xf32> -> vector<64x16xf32>
    %32 = arith.addf %27, %31 : vector<64x16xf32>
    %33 = vector.extract_strided_slice %3 {offsets = [384, 0], sizes = [64, 6], strides = [1, 1]} : vector<576x6xbf16> to vector<64x6xbf16>
    %c6 = arith.constant 6 : index
    %c0_22 = arith.constant 0 : index
    %c0_23 = arith.constant 0 : index
    %34 = vector.load %arg4[%c6, %c0_22, %c0_23] : memref<9x6x16xbf16, #tpu.memory_space<vmem>>, vector<1x6x16xbf16>
    %35 = vector.shape_cast %34 : vector<1x6x16xbf16> to vector<6x16xbf16>
    %cst_24 = arith.constant dense<0.000000e+00> : vector<64x16xf32>
    %36 = tpu.matmul %33, %35, %cst_24 {dimension_numbers = #tpu.dot_dimension_numbers<[1], [0], [0], [1], [0, 0, 1, 1], [], []>} : vector<64x6xbf16>, vector<6x16xbf16>, vector<64x16xf32> -> vector<64x16xf32>
    %37 = arith.addf %32, %36 : vector<64x16xf32>
    %38 = vector.extract_strided_slice %3 {offsets = [448, 0], sizes = [64, 6], strides = [1, 1]} : vector<576x6xbf16> to vector<64x6xbf16>
    %c7 = arith.constant 7 : index
    %c0_25 = arith.constant 0 : index
    %c0_26 = arith.constant 0 : index
    %39 = vector.load %arg4[%c7, %c0_25, %c0_26] : memref<9x6x16xbf16, #tpu.memory_space<vmem>>, vector<1x6x16xbf16>
    %40 = vector.shape_cast %39 : vector<1x6x16xbf16> to vector<6x16xbf16>
    %cst_27 = arith.constant dense<0.000000e+00> : vector<64x16xf32>
    %41 = tpu.matmul %38, %40, %cst_27 {dimension_numbers = #tpu.dot_dimension_numbers<[1], [0], [0], [1], [0, 0, 1, 1], [], []>} : vector<64x6xbf16>, vector<6x16xbf16>, vector<64x16xf32> -> vector<64x16xf32>
    %42 = arith.addf %37, %41 : vector<64x16xf32>
    %43 = vector.extract_strided_slice %3 {offsets = [512, 0], sizes = [64, 6], strides = [1, 1]} : vector<576x6xbf16> to vector<64x6xbf16>
    %c8 = arith.constant 8 : index
    %c0_28 = arith.constant 0 : index
    %c0_29 = arith.constant 0 : index
    %44 = vector.load %arg4[%c8, %c0_28, %c0_29] : memref<9x6x16xbf16, #tpu.memory_space<vmem>>, vector<1x6x16xbf16>
    %45 = vector.shape_cast %44 : vector<1x6x16xbf16> to vector<6x16xbf16>
    %cst_30 = arith.constant dense<0.000000e+00> : vector<64x16xf32>
    %46 = tpu.matmul %43, %45, %cst_30 {dimension_numbers = #tpu.dot_dimension_numbers<[1], [0], [0], [1], [0, 0, 1, 1], [], []>} : vector<64x6xbf16>, vector<6x16xbf16>, vector<64x16xf32> -> vector<64x16xf32>
    %47 = arith.addf %42, %46 : vector<64x16xf32>
    %c0_31 = arith.constant 0 : index
    %c0_32 = arith.constant 0 : index
    %48 = vector.load %arg7[%c0_31, %c0_32] : memref<1x16xf32, #tpu.memory_space<vmem>>, vector<1x16xf32>
    %49 = vector.broadcast %48 : vector<1x16xf32> to vector<64x16xf32>
    %50 = arith.addf %47, %49 : vector<64x16xf32>
    %cst_33 = arith.constant 0.000000e+00 : f32
    %51 = vector.broadcast %cst_33 : f32 to vector<64x16xf32>
    %52 = arith.maximumf %50, %51 : vector<64x16xf32>
    %53 = arith.truncf %52 : vector<64x16xf32> to vector<64x16xbf16>
    %c0_34 = arith.constant 0 : index
    %c0_35 = arith.constant 0 : index
    %54 = vector.load %arg2[%c0_34, %c0_35] : memref<144x64xbf16, #tpu.memory_space<vmem>>, vector<144x64xbf16>
    %cst_36 = arith.constant dense<0.000000e+00> : vector<144x16xf32>
    %55 = tpu.matmul %54, %53, %cst_36 {dimension_numbers = #tpu.dot_dimension_numbers<[1], [0], [0], [1], [0, 0, 1, 1], [], []>} : vector<144x64xbf16>, vector<64x16xbf16>, vector<144x16xf32> -> vector<144x16xf32>
    %56 = arith.truncf %55 : vector<144x16xf32> to vector<144x16xbf16>
    %57 = vector.extract_strided_slice %56 {offsets = [0, 0], sizes = [16, 16], strides = [1, 1]} : vector<144x16xbf16> to vector<16x16xbf16>
    %c0_37 = arith.constant 0 : index
    %c0_38 = arith.constant 0 : index
    %c0_39 = arith.constant 0 : index
    %58 = vector.load %arg5[%c0_37, %c0_38, %c0_39] : memref<9x16x32xbf16, #tpu.memory_space<vmem>>, vector<1x16x32xbf16>
    %59 = vector.shape_cast %58 : vector<1x16x32xbf16> to vector<16x32xbf16>
    %cst_40 = arith.constant dense<0.000000e+00> : vector<16x32xf32>
    %60 = tpu.matmul %57, %59, %cst_40 {dimension_numbers = #tpu.dot_dimension_numbers<[1], [0], [0], [1], [0, 0, 1, 1], [], []>} : vector<16x16xbf16>, vector<16x32xbf16>, vector<16x32xf32> -> vector<16x32xf32>
    %61 = vector.extract_strided_slice %56 {offsets = [16, 0], sizes = [16, 16], strides = [1, 1]} : vector<144x16xbf16> to vector<16x16xbf16>
    %c1_41 = arith.constant 1 : index
    %c0_42 = arith.constant 0 : index
    %c0_43 = arith.constant 0 : index
    %62 = vector.load %arg5[%c1_41, %c0_42, %c0_43] : memref<9x16x32xbf16, #tpu.memory_space<vmem>>, vector<1x16x32xbf16>
    %63 = vector.shape_cast %62 : vector<1x16x32xbf16> to vector<16x32xbf16>
    %cst_44 = arith.constant dense<0.000000e+00> : vector<16x32xf32>
    %64 = tpu.matmul %61, %63, %cst_44 {dimension_numbers = #tpu.dot_dimension_numbers<[1], [0], [0], [1], [0, 0, 1, 1], [], []>} : vector<16x16xbf16>, vector<16x32xbf16>, vector<16x32xf32> -> vector<16x32xf32>
    %65 = arith.addf %60, %64 : vector<16x32xf32>
    %66 = vector.extract_strided_slice %56 {offsets = [32, 0], sizes = [16, 16], strides = [1, 1]} : vector<144x16xbf16> to vector<16x16xbf16>
    %c2_45 = arith.constant 2 : index
    %c0_46 = arith.constant 0 : index
    %c0_47 = arith.constant 0 : index
    %67 = vector.load %arg5[%c2_45, %c0_46, %c0_47] : memref<9x16x32xbf16, #tpu.memory_space<vmem>>, vector<1x16x32xbf16>
    %68 = vector.shape_cast %67 : vector<1x16x32xbf16> to vector<16x32xbf16>
    %cst_48 = arith.constant dense<0.000000e+00> : vector<16x32xf32>
    %69 = tpu.matmul %66, %68, %cst_48 {dimension_numbers = #tpu.dot_dimension_numbers<[1], [0], [0], [1], [0, 0, 1, 1], [], []>} : vector<16x16xbf16>, vector<16x32xbf16>, vector<16x32xf32> -> vector<16x32xf32>
    %70 = arith.addf %65, %69 : vector<16x32xf32>
    %71 = vector.extract_strided_slice %56 {offsets = [48, 0], sizes = [16, 16], strides = [1, 1]} : vector<144x16xbf16> to vector<16x16xbf16>
    %c3_49 = arith.constant 3 : index
    %c0_50 = arith.constant 0 : index
    %c0_51 = arith.constant 0 : index
    %72 = vector.load %arg5[%c3_49, %c0_50, %c0_51] : memref<9x16x32xbf16, #tpu.memory_space<vmem>>, vector<1x16x32xbf16>
    %73 = vector.shape_cast %72 : vector<1x16x32xbf16> to vector<16x32xbf16>
    %cst_52 = arith.constant dense<0.000000e+00> : vector<16x32xf32>
    %74 = tpu.matmul %71, %73, %cst_52 {dimension_numbers = #tpu.dot_dimension_numbers<[1], [0], [0], [1], [0, 0, 1, 1], [], []>} : vector<16x16xbf16>, vector<16x32xbf16>, vector<16x32xf32> -> vector<16x32xf32>
    %75 = arith.addf %70, %74 : vector<16x32xf32>
    %76 = vector.extract_strided_slice %56 {offsets = [64, 0], sizes = [16, 16], strides = [1, 1]} : vector<144x16xbf16> to vector<16x16xbf16>
    %c4_53 = arith.constant 4 : index
    %c0_54 = arith.constant 0 : index
    %c0_55 = arith.constant 0 : index
    %77 = vector.load %arg5[%c4_53, %c0_54, %c0_55] : memref<9x16x32xbf16, #tpu.memory_space<vmem>>, vector<1x16x32xbf16>
    %78 = vector.shape_cast %77 : vector<1x16x32xbf16> to vector<16x32xbf16>
    %cst_56 = arith.constant dense<0.000000e+00> : vector<16x32xf32>
    %79 = tpu.matmul %76, %78, %cst_56 {dimension_numbers = #tpu.dot_dimension_numbers<[1], [0], [0], [1], [0, 0, 1, 1], [], []>} : vector<16x16xbf16>, vector<16x32xbf16>, vector<16x32xf32> -> vector<16x32xf32>
    %80 = arith.addf %75, %79 : vector<16x32xf32>
    %81 = vector.extract_strided_slice %56 {offsets = [80, 0], sizes = [16, 16], strides = [1, 1]} : vector<144x16xbf16> to vector<16x16xbf16>
    %c5_57 = arith.constant 5 : index
    %c0_58 = arith.constant 0 : index
    %c0_59 = arith.constant 0 : index
    %82 = vector.load %arg5[%c5_57, %c0_58, %c0_59] : memref<9x16x32xbf16, #tpu.memory_space<vmem>>, vector<1x16x32xbf16>
    %83 = vector.shape_cast %82 : vector<1x16x32xbf16> to vector<16x32xbf16>
    %cst_60 = arith.constant dense<0.000000e+00> : vector<16x32xf32>
    %84 = tpu.matmul %81, %83, %cst_60 {dimension_numbers = #tpu.dot_dimension_numbers<[1], [0], [0], [1], [0, 0, 1, 1], [], []>} : vector<16x16xbf16>, vector<16x32xbf16>, vector<16x32xf32> -> vector<16x32xf32>
    %85 = arith.addf %80, %84 : vector<16x32xf32>
    %86 = vector.extract_strided_slice %56 {offsets = [96, 0], sizes = [16, 16], strides = [1, 1]} : vector<144x16xbf16> to vector<16x16xbf16>
    %c6_61 = arith.constant 6 : index
    %c0_62 = arith.constant 0 : index
    %c0_63 = arith.constant 0 : index
    %87 = vector.load %arg5[%c6_61, %c0_62, %c0_63] : memref<9x16x32xbf16, #tpu.memory_space<vmem>>, vector<1x16x32xbf16>
    %88 = vector.shape_cast %87 : vector<1x16x32xbf16> to vector<16x32xbf16>
    %cst_64 = arith.constant dense<0.000000e+00> : vector<16x32xf32>
    %89 = tpu.matmul %86, %88, %cst_64 {dimension_numbers = #tpu.dot_dimension_numbers<[1], [0], [0], [1], [0, 0, 1, 1], [], []>} : vector<16x16xbf16>, vector<16x32xbf16>, vector<16x32xf32> -> vector<16x32xf32>
    %90 = arith.addf %85, %89 : vector<16x32xf32>
    %91 = vector.extract_strided_slice %56 {offsets = [112, 0], sizes = [16, 16], strides = [1, 1]} : vector<144x16xbf16> to vector<16x16xbf16>
    %c7_65 = arith.constant 7 : index
    %c0_66 = arith.constant 0 : index
    %c0_67 = arith.constant 0 : index
    %92 = vector.load %arg5[%c7_65, %c0_66, %c0_67] : memref<9x16x32xbf16, #tpu.memory_space<vmem>>, vector<1x16x32xbf16>
    %93 = vector.shape_cast %92 : vector<1x16x32xbf16> to vector<16x32xbf16>
    %cst_68 = arith.constant dense<0.000000e+00> : vector<16x32xf32>
    %94 = tpu.matmul %91, %93, %cst_68 {dimension_numbers = #tpu.dot_dimension_numbers<[1], [0], [0], [1], [0, 0, 1, 1], [], []>} : vector<16x16xbf16>, vector<16x32xbf16>, vector<16x32xf32> -> vector<16x32xf32>
    %95 = arith.addf %90, %94 : vector<16x32xf32>
    %96 = vector.extract_strided_slice %56 {offsets = [128, 0], sizes = [16, 16], strides = [1, 1]} : vector<144x16xbf16> to vector<16x16xbf16>
    %c8_69 = arith.constant 8 : index
    %c0_70 = arith.constant 0 : index
    %c0_71 = arith.constant 0 : index
    %97 = vector.load %arg5[%c8_69, %c0_70, %c0_71] : memref<9x16x32xbf16, #tpu.memory_space<vmem>>, vector<1x16x32xbf16>
    %98 = vector.shape_cast %97 : vector<1x16x32xbf16> to vector<16x32xbf16>
    %cst_72 = arith.constant dense<0.000000e+00> : vector<16x32xf32>
    %99 = tpu.matmul %96, %98, %cst_72 {dimension_numbers = #tpu.dot_dimension_numbers<[1], [0], [0], [1], [0, 0, 1, 1], [], []>} : vector<16x16xbf16>, vector<16x32xbf16>, vector<16x32xf32> -> vector<16x32xf32>
    %100 = arith.addf %95, %99 : vector<16x32xf32>
    %c0_73 = arith.constant 0 : index
    %c0_74 = arith.constant 0 : index
    %101 = vector.load %arg8[%c0_73, %c0_74] : memref<1x32xf32, #tpu.memory_space<vmem>>, vector<1x32xf32>
    %102 = vector.broadcast %101 : vector<1x32xf32> to vector<16x32xf32>
    %103 = arith.addf %100, %102 : vector<16x32xf32>
    %cst_75 = arith.constant 0.000000e+00 : f32
    %104 = vector.broadcast %cst_75 : f32 to vector<16x32xf32>
    %105 = arith.maximumf %103, %104 : vector<16x32xf32>
    %106 = arith.truncf %105 : vector<16x32xf32> to vector<16x32xbf16>
    %c0_76 = arith.constant 0 : index
    %c0_77 = arith.constant 0 : index
    %107 = vector.load %arg3[%c0_76, %c0_77] : memref<72x16xbf16, #tpu.memory_space<vmem>>, vector<72x16xbf16>
    %cst_78 = arith.constant dense<0.000000e+00> : vector<72x32xf32>
    %108 = tpu.matmul %107, %106, %cst_78 {dimension_numbers = #tpu.dot_dimension_numbers<[1], [0], [0], [1], [0, 0, 1, 1], [], []>} : vector<72x16xbf16>, vector<16x32xbf16>, vector<72x32xf32> -> vector<72x32xf32>
    %109 = arith.truncf %108 : vector<72x32xf32> to vector<72x32xbf16>
    %110 = vector.extract_strided_slice %109 {offsets = [0, 0], sizes = [8, 32], strides = [1, 1]} : vector<72x32xbf16> to vector<8x32xbf16>
    %c0_79 = arith.constant 0 : index
    %c0_80 = arith.constant 0 : index
    %c0_81 = arith.constant 0 : index
    %111 = vector.load %arg6[%c0_79, %c0_80, %c0_81] : memref<9x32x128xbf16, #tpu.memory_space<vmem>>, vector<1x32x128xbf16>
    %112 = vector.shape_cast %111 : vector<1x32x128xbf16> to vector<32x128xbf16>
    %cst_82 = arith.constant dense<0.000000e+00> : vector<8x128xf32>
    %113 = tpu.matmul %110, %112, %cst_82 {dimension_numbers = #tpu.dot_dimension_numbers<[1], [0], [0], [1], [0, 0, 1, 1], [], []>} : vector<8x32xbf16>, vector<32x128xbf16>, vector<8x128xf32> -> vector<8x128xf32>
    %114 = vector.extract_strided_slice %109 {offsets = [8, 0], sizes = [8, 32], strides = [1, 1]} : vector<72x32xbf16> to vector<8x32xbf16>
    %c1_83 = arith.constant 1 : index
    %c0_84 = arith.constant 0 : index
    %c0_85 = arith.constant 0 : index
    %115 = vector.load %arg6[%c1_83, %c0_84, %c0_85] : memref<9x32x128xbf16, #tpu.memory_space<vmem>>, vector<1x32x128xbf16>
    %116 = vector.shape_cast %115 : vector<1x32x128xbf16> to vector<32x128xbf16>
    %cst_86 = arith.constant dense<0.000000e+00> : vector<8x128xf32>
    %117 = tpu.matmul %114, %116, %cst_86 {dimension_numbers = #tpu.dot_dimension_numbers<[1], [0], [0], [1], [0, 0, 1, 1], [], []>} : vector<8x32xbf16>, vector<32x128xbf16>, vector<8x128xf32> -> vector<8x128xf32>
    %118 = arith.addf %113, %117 : vector<8x128xf32>
    %119 = vector.extract_strided_slice %109 {offsets = [16, 0], sizes = [8, 32], strides = [1, 1]} : vector<72x32xbf16> to vector<8x32xbf16>
    %c2_87 = arith.constant 2 : index
    %c0_88 = arith.constant 0 : index
    %c0_89 = arith.constant 0 : index
    %120 = vector.load %arg6[%c2_87, %c0_88, %c0_89] : memref<9x32x128xbf16, #tpu.memory_space<vmem>>, vector<1x32x128xbf16>
    %121 = vector.shape_cast %120 : vector<1x32x128xbf16> to vector<32x128xbf16>
    %cst_90 = arith.constant dense<0.000000e+00> : vector<8x128xf32>
    %122 = tpu.matmul %119, %121, %cst_90 {dimension_numbers = #tpu.dot_dimension_numbers<[1], [0], [0], [1], [0, 0, 1, 1], [], []>} : vector<8x32xbf16>, vector<32x128xbf16>, vector<8x128xf32> -> vector<8x128xf32>
    %123 = arith.addf %118, %122 : vector<8x128xf32>
    %124 = vector.extract_strided_slice %109 {offsets = [24, 0], sizes = [8, 32], strides = [1, 1]} : vector<72x32xbf16> to vector<8x32xbf16>
    %c3_91 = arith.constant 3 : index
    %c0_92 = arith.constant 0 : index
    %c0_93 = arith.constant 0 : index
    %125 = vector.load %arg6[%c3_91, %c0_92, %c0_93] : memref<9x32x128xbf16, #tpu.memory_space<vmem>>, vector<1x32x128xbf16>
    %126 = vector.shape_cast %125 : vector<1x32x128xbf16> to vector<32x128xbf16>
    %cst_94 = arith.constant dense<0.000000e+00> : vector<8x128xf32>
    %127 = tpu.matmul %124, %126, %cst_94 {dimension_numbers = #tpu.dot_dimension_numbers<[1], [0], [0], [1], [0, 0, 1, 1], [], []>} : vector<8x32xbf16>, vector<32x128xbf16>, vector<8x128xf32> -> vector<8x128xf32>
    %128 = arith.addf %123, %127 : vector<8x128xf32>
    %129 = vector.extract_strided_slice %109 {offsets = [32, 0], sizes = [8, 32], strides = [1, 1]} : vector<72x32xbf16> to vector<8x32xbf16>
    %c4_95 = arith.constant 4 : index
    %c0_96 = arith.constant 0 : index
    %c0_97 = arith.constant 0 : index
    %130 = vector.load %arg6[%c4_95, %c0_96, %c0_97] : memref<9x32x128xbf16, #tpu.memory_space<vmem>>, vector<1x32x128xbf16>
    %131 = vector.shape_cast %130 : vector<1x32x128xbf16> to vector<32x128xbf16>
    %cst_98 = arith.constant dense<0.000000e+00> : vector<8x128xf32>
    %132 = tpu.matmul %129, %131, %cst_98 {dimension_numbers = #tpu.dot_dimension_numbers<[1], [0], [0], [1], [0, 0, 1, 1], [], []>} : vector<8x32xbf16>, vector<32x128xbf16>, vector<8x128xf32> -> vector<8x128xf32>
    %133 = arith.addf %128, %132 : vector<8x128xf32>
    %134 = vector.extract_strided_slice %109 {offsets = [40, 0], sizes = [8, 32], strides = [1, 1]} : vector<72x32xbf16> to vector<8x32xbf16>
    %c5_99 = arith.constant 5 : index
    %c0_100 = arith.constant 0 : index
    %c0_101 = arith.constant 0 : index
    %135 = vector.load %arg6[%c5_99, %c0_100, %c0_101] : memref<9x32x128xbf16, #tpu.memory_space<vmem>>, vector<1x32x128xbf16>
    %136 = vector.shape_cast %135 : vector<1x32x128xbf16> to vector<32x128xbf16>
    %cst_102 = arith.constant dense<0.000000e+00> : vector<8x128xf32>
    %137 = tpu.matmul %134, %136, %cst_102 {dimension_numbers = #tpu.dot_dimension_numbers<[1], [0], [0], [1], [0, 0, 1, 1], [], []>} : vector<8x32xbf16>, vector<32x128xbf16>, vector<8x128xf32> -> vector<8x128xf32>
    %138 = arith.addf %133, %137 : vector<8x128xf32>
    %139 = vector.extract_strided_slice %109 {offsets = [48, 0], sizes = [8, 32], strides = [1, 1]} : vector<72x32xbf16> to vector<8x32xbf16>
    %c6_103 = arith.constant 6 : index
    %c0_104 = arith.constant 0 : index
    %c0_105 = arith.constant 0 : index
    %140 = vector.load %arg6[%c6_103, %c0_104, %c0_105] : memref<9x32x128xbf16, #tpu.memory_space<vmem>>, vector<1x32x128xbf16>
    %141 = vector.shape_cast %140 : vector<1x32x128xbf16> to vector<32x128xbf16>
    %cst_106 = arith.constant dense<0.000000e+00> : vector<8x128xf32>
    %142 = tpu.matmul %139, %141, %cst_106 {dimension_numbers = #tpu.dot_dimension_numbers<[1], [0], [0], [1], [0, 0, 1, 1], [], []>} : vector<8x32xbf16>, vector<32x128xbf16>, vector<8x128xf32> -> vector<8x128xf32>
    %143 = arith.addf %138, %142 : vector<8x128xf32>
    %144 = vector.extract_strided_slice %109 {offsets = [56, 0], sizes = [8, 32], strides = [1, 1]} : vector<72x32xbf16> to vector<8x32xbf16>
    %c7_107 = arith.constant 7 : index
    %c0_108 = arith.constant 0 : index
    %c0_109 = arith.constant 0 : index
    %145 = vector.load %arg6[%c7_107, %c0_108, %c0_109] : memref<9x32x128xbf16, #tpu.memory_space<vmem>>, vector<1x32x128xbf16>
    %146 = vector.shape_cast %145 : vector<1x32x128xbf16> to vector<32x128xbf16>
    %cst_110 = arith.constant dense<0.000000e+00> : vector<8x128xf32>
    %147 = tpu.matmul %144, %146, %cst_110 {dimension_numbers = #tpu.dot_dimension_numbers<[1], [0], [0], [1], [0, 0, 1, 1], [], []>} : vector<8x32xbf16>, vector<32x128xbf16>, vector<8x128xf32> -> vector<8x128xf32>
    %148 = arith.addf %143, %147 : vector<8x128xf32>
    %149 = vector.extract_strided_slice %109 {offsets = [64, 0], sizes = [8, 32], strides = [1, 1]} : vector<72x32xbf16> to vector<8x32xbf16>
    %c8_111 = arith.constant 8 : index
    %c0_112 = arith.constant 0 : index
    %c0_113 = arith.constant 0 : index
    %150 = vector.load %arg6[%c8_111, %c0_112, %c0_113] : memref<9x32x128xbf16, #tpu.memory_space<vmem>>, vector<1x32x128xbf16>
    %151 = vector.shape_cast %150 : vector<1x32x128xbf16> to vector<32x128xbf16>
    %cst_114 = arith.constant dense<0.000000e+00> : vector<8x128xf32>
    %152 = tpu.matmul %149, %151, %cst_114 {dimension_numbers = #tpu.dot_dimension_numbers<[1], [0], [0], [1], [0, 0, 1, 1], [], []>} : vector<8x32xbf16>, vector<32x128xbf16>, vector<8x128xf32> -> vector<8x128xf32>
    %153 = arith.addf %148, %152 : vector<8x128xf32>
    %c0_115 = arith.constant 0 : index
    %c0_116 = arith.constant 0 : index
    %154 = vector.load %arg9[%c0_115, %c0_116] : memref<1x128xf32, #tpu.memory_space<vmem>>, vector<1x128xf32>
    %155 = vector.broadcast %154 : vector<1x128xf32> to vector<8x128xf32>
    %156 = arith.addf %153, %155 : vector<8x128xf32>
    %cst_117 = arith.constant 0.000000e+00 : f32
    %157 = vector.broadcast %cst_117 : f32 to vector<8x128xf32>
    %158 = arith.maximumf %156, %157 : vector<8x128xf32>
    %c0_118 = arith.constant 0 : index
    %c0_119 = arith.constant 0 : index
    %159 = vector.load %arg10[%c0_118, %c0_119] : memref<8x128xf32, #tpu.memory_space<vmem>>, vector<8x128xf32>
    tpu.vector_store %arg10[%c0_118, %c0_119], %158 {strides = array<i32>} : memref<8x128xf32, #tpu.memory_space<vmem>>, vector<8x128xf32>,
    return
  }
}

</mosaic_0001>

<bundles_post_ra>
// kernel: fwd.1
= control target key start
LH: loop header
LB: loop body
LE: loop exit
PB: predicated region body
PF: predicated region fallthrough
CT: control target
= control target key end

     0   :  { %15 = vsyncpa [#allocation3], 0  ;;  %s4603_s0 = inlined_call_operand.vmem [shape: bf16[256,6], index: 0, kind: input, shape index: {}]   ;;  %s4604_s1 = inlined_call_operand.hbm [shape: bf16[576,256], index: 1, kind: input, shape index: {}]   ;;  %s4605_s2 = inlined_call_operand.vmem [shape: bf16[144,64], index: 2, kind: input, shape index: {}]   ;;  %s4606_s3 = inlined_call_operand.hbm [shape: bf16[72,16], index: 3, kind: input, shape index: {}]   ;;  %s4607_s4 = inlined_call_operand.vmem [shape: bf16[9,6,16], index: 4, kind: input, shape index: {}]   ;;  %s4608_s5 = inlined_call_operand.vmem [shape: bf16[9,16,32], index: 5, kind: input, shape index: {}]   ;;  %s4609_s6 = inlined_call_operand.vmem [shape: bf16[9,32,128], index: 6, kind: input, shape index: {}]   ;;  %s4610_s7 = inlined_call_operand.vmem [shape: f32[1,16], index: 7, kind: input, shape index: {}]   ;;  %s4611_s8 = inlined_call_operand.vmem [shape: f32[1,32], index: 8, kind: input, shape index: {}]   ;;  %s4612_s9 = inlined_call_operand.vmem [shape: f32[1,128], index: 9, kind: input, shape index: {}]   ;;  %s4613_s10 = inlined_call_operand.vmem [shape: f32[8,128], index: 10, kind: output, shape index: {}]  }
   0x1   :  { %16 = vsyncpa [#allocation5], 0  ;;  %s4080_s13 = smov [#allocation2]  }
   0x2   :  { %s24_s14 = sshll.u32 %s4080_s13, 4  ;;  %s25_s14 = int_to_ptr.vmem [resolvable:$true] %s24_s14 }
   0x3   :  { %s4044_s15 = scalar_lea.vmem %s25_s14, 9216  ;;  %p4049_p1 = scmp.lt.s32.totalorder %s25_s14, %s25_s14 }
   0x4   :  { %p4045_p0 = scmp.ne.s32.totalorder %s25_s14, %s4044_s15  ;;  %p4050_p2 = scmp.lt.s32.totalorder %s4044_s15, %s4044_s15 }
   0x6   :  { %p4051_p3 = por %p4050_p2, %p4049_p1 }
   0x8   :  { %p4052_p4 = pnand %p4051_p3, %p4045_p0 }
   0xa   :  { %4055 = shalt.err (!%p4052_p4)
}
   0xb   :  { %s4081_s16 = smov 128   ;;  %s4082_s17 = smov 8  }
   0xc   :  { %30 = dma.hbm_to_vmem [thread:$0]  %s4604_s1, 9216, %s25_s14, [#allocation3], %s4081_s16, %s4081_s16, %s4082_s17  }
   0xd   :  { %s4083_s20 = smov [#allocation4]  }
   0xe   :  { %s38_s21 = sshll.u32 %s4083_s20, 4  ;;  %s39_s21 = int_to_ptr.vmem [resolvable:$true] %s38_s21 }
   0xf   :  { %s4064_s22 = scalar_lea.vmem %s39_s21, 576  ;;  %p4069_p6 = scmp.lt.s32.totalorder %s39_s21, %s39_s21 }
  0x10   :  { %p4065_p5 = scmp.ne.s32.totalorder %s39_s21, %s4064_s22  ;;  %p4070_p7 = scmp.lt.s32.totalorder %s4064_s22, %s4064_s22 }
  0x12   :  { %p4071_p8 = por %p4070_p7, %p4069_p6 }
  0x14   :  { %p4072_p9 = pnand %p4071_p8, %p4065_p5 }
  0x16   :  { %4075 = shalt.err (!%p4072_p9)
}
  0x17   :  { %s4084_s23 = smov 64   ;;  %s4085_s24 = smov 4  }
  0x18   :  { %44 = dma.hbm_to_vmem [thread:$0]  %s4606_s3, 576, %s39_s21, [#allocation5], %s4084_s23, %s4084_s23, %s4085_s24  }
  0x19   :  { %4076 = dma.done.wait [#allocation3], 9216  }
  0x1a   :  { %4077 = vsyncadd [#allocation3], 4294958080 }
  0x1b   :  { %4078 = dma.done.wait [#allocation5], 576  }
  0x1c   :  { %4079 = vsyncadd [#allocation5], 4294966720  ;;  %v4086_v0 = vmov 0   ;;  %v3871_v1 = vld [vmem:[%s4603_s0 + $0x38] sm:$0xff]   ;;  %v3872_v2 = vld [vmem:[%s4603_s0 + $0x30] sm:$0xff]   ;;  %vm997_vm0 = vcmask 1042432  }
  0x1d   :  { %624 = vmatprep.subr.bf16.mxu0 %v4086_v0  ;;  %v3873_v3 = vld [vmem:[%s4603_s0 + $0x28] sm:$0xff]   ;;  %v3874_v4 = vld [vmem:[%s4603_s0 + $0x20] sm:$0xff]   ;;  %v3875_v5 = vld [vmem:[%s4603_s0 + $0x18] sm:$0xff]   ;;  %vm984_vm1 = vcmask 48128   ;;  %vm4088_vm2 = vmmov 0   ;;  %vm1866_vm3 = vcmask 523264  }
  0x1e   :  { %625 = vmatpush1.bf16.msra.mxu0 %v3871_v1  ;;  %v3889_v6 = vld [vmem:[#allocation2 + $0x4] ss:$8 sps:$4 sm:$0xff]   ;;  %v3876_v7 = vld [vmem:[%s4603_s0 + $0x10] sm:$0xff]   ;;  %v3879_v10 = vld [vmem:[%s4603_s0 + $0x78] sm:$0xff]   ;;  %vm2019_vm4 = vcmask 130048   ;;  %vm2658_vm5 = vcmask 261120  }
  0x1f   :  { %626 = vmatprep.subr.bf16.mxu0 %v4086_v0  ;;  %656 = vmatprep.mubr.bf16.mxu0 %v3889_v6  ;;  %v3877_v8 = vld [vmem:[%s4603_s0 + $0x8] sm:$0xff]   ;;  %v3878_v9 = vld [vmem:[%s4603_s0] sm:$0xff]   ;;  %v3880_v11 = vld [vmem:[%s4603_s0 + $0x70] sm:$0xff]  }
  0x20   :  { %v3881_v12 = vld [vmem:[%s4603_s0 + $0x68] sm:$0xff]   ;;  %v3882_v13 = vld [vmem:[%s4603_s0 + $0x60] sm:$0xff]   ;;  %v3883_v14 = vld [vmem:[%s4603_s0 + $0x58] sm:$0xff]  }
  0x21   :  { %v3884_v15 = vld [vmem:[%s4603_s0 + $0x50] sm:$0xff]   ;;  %v3885_v16 = vld [vmem:[%s4603_s0 + $0x48] sm:$0xff]   ;;  %v3886_v17 = vld [vmem:[%s4603_s0 + $0x40] sm:$0xff]  }
  0x22   :  { %627 = vmatpush1.bf16.msra.mxu0 %v3872_v2  ;;  %v3887_v18 = vld [vmem:[#allocation2] ss:$8 sps:$4 sm:$0xff]   ;;  %v3890_v19 = vld [vmem:[#allocation2 + $0x14] ss:$8 sps:$4 sm:$0xff]   ;;  %v3892_v20 = vld [vmem:[#allocation2 + $0x10] ss:$8 sps:$4 sm:$0xff]  }
  0x23   :  { %628 = vmatprep.subr.bf16.mxu0 %v4086_v0  ;;  %v3893_v21 = vld [vmem:[#allocation2 + $0x24] ss:$8 sps:$4 sm:$0xff]   ;;  %v3895_v22 = vld [vmem:[#allocation2 + $0x20] ss:$8 sps:$4 sm:$0xff]   ;;  %v3896_v23 = vld [vmem:[#allocation2 + $0x34] ss:$8 sps:$4 sm:$0xff]  }
  0x24   :  { %v3898_v24 = vld [vmem:[#allocation2 + $0x30] ss:$8 sps:$4 sm:$0xff]   ;;  %v3899_v25 = vld [vmem:[#allocation2 + $0x44] ss:$8 sps:$4 sm:$0xff]   ;;  %v3901_v26 = vld [vmem:[#allocation2 + $0x40] ss:$8 sps:$4 sm:$0xff]  }
  0x25   :  { %v3902_v27 = vld [vmem:[#allocation2 + $0x54] ss:$8 sps:$4 sm:$0xff]   ;;  %v3904_v28 = vld [vmem:[#allocation2 + $0x50] ss:$8 sps:$4 sm:$0xff]   ;;  %v3905_v29 = vld [vmem:[#allocation2 + $0x64] ss:$8 sps:$4 sm:$0xff]  }
  0x26   :  { %629 = vmatpush1.bf16.msra.mxu0 %v3873_v3  ;;  %v3907_v30 = vld [vmem:[#allocation2 + $0x60] ss:$8 sps:$4 sm:$0xff]   ;;  %v3908_v31 = vld [vmem:[#allocation2 + $0x74] ss:$8 sps:$4 sm:$0xff]   ;;  %v3910_v32 = vld [vmem:[#allocation2 + $0x70] ss:$8 sps:$4 sm:$0xff]  }
  0x27   :  { %630 = vmatprep.subr.bf16.mxu0 %v4086_v0  ;;  %v3911_v33 = vld [vmem:[#allocation2 + $0x84] ss:$8 sps:$4 sm:$0xff]   ;;  %v3913_v34 = vld [vmem:[#allocation2 + $0x80] ss:$8 sps:$4 sm:$0xff]   ;;  %v3914_v35 = vld [vmem:[#allocation2 + $0x94] ss:$8 sps:$4 sm:$0xff]  }
  0x28   :  { %v3916_v36 = vld [vmem:[#allocation2 + $0x90] ss:$8 sps:$4 sm:$0xff]   ;;  %v3917_v37 = vld [vmem:[#allocation2 + $0xa4] ss:$8 sps:$4 sm:$0xff]   ;;  %v3919_v38 = vld [vmem:[#allocation2 + $0xa0] ss:$8 sps:$4 sm:$0xff]  }
  0x29   :  { %v3920_v39 = vld [vmem:[#allocation2 + $0xb4] ss:$8 sps:$4 sm:$0xff]   ;;  %v3922_v40 = vld [vmem:[#allocation2 + $0xb0] ss:$8 sps:$4 sm:$0xff]   ;;  %v3923_v41 = vld [vmem:[#allocation2 + $0xc4] ss:$8 sps:$4 sm:$0xff]  }
  0x2a   :  { %631 = vmatpush1.bf16.msra.mxu0 %v3874_v4  ;;  %v3925_v42 = vld [vmem:[#allocation2 + $0xc0] ss:$8 sps:$4 sm:$0xff]   ;;  %v3926_v43 = vld [vmem:[#allocation2 + $0xd4] ss:$8 sps:$4 sm:$0xff]   ;;  %v3928_v44 = vld [vmem:[#allocation2 + $0xd0] ss:$8 sps:$4 sm:$0xff]  }
  0x2b   :  { %632 = vmatprep.subr.bf16.mxu0 %v4086_v0  ;;  %v3929_v45 = vld [vmem:[#allocation2 + $0xe4] ss:$8 sps:$4 sm:$0xff]   ;;  %v3931_v48 = vld [vmem:[#allocation2 + $0xe0] ss:$8 sps:$4 sm:$0xff]   ;;  %v3932_v49 = vld [vmem:[#allocation2 + $0xf4] ss:$8 sps:$4 sm:$0xff]  }
  0x2c   :  { %v3294_v46 = vld [vmem:[%s4607_s4 + $0x4] sm:$0x7]  ;;  %v3934_v50 = vld [vmem:[#allocation2 + $0xf0] ss:$8 sps:$4 sm:$0xff]   ;;  %v3937_v52 = vld [vmem:[#allocation2 + $0x100] ss:$8 sps:$4 sm:$0xff]  }
  0x2d   :  { %3853 = vmatprep.subr.msk.bf16.mxu1 %vm997_vm0, %v3294_v46  ;;  %v999_v47 = vsel %vm997_vm0, %v3294_v46, 0  ;;  %v3935_v51 = vld [vmem:[#allocation2 + $0x104] ss:$8 sps:$4 sm:$0xff]   ;;  %v3938_v53 = vld [vmem:[#allocation2 + $0x114] ss:$8 sps:$4 sm:$0xff]  }
  0x2e   :  { %633 = vmatpush1.bf16.msra.mxu0 %v3875_v5  ;;  %3572 = vmatpush3.bf16.msra.mxu1 %v999_v47  ;;  %v4206_v54 = vld [vmem:[%s4607_s4] sm:$0x7]  ;;  %v3940_v55 = vld [vmem:[#allocation2 + $0x110] ss:$8 sps:$4 sm:$0xff]   ;;  %v3941_v56 = vld [vmem:[#allocation2 + $0x124] ss:$8 sps:$4 sm:$0xff]  }
  0x2f   :  { %634 = vmatprep.subr.bf16.mxu0 %v4086_v0  ;;  %3854 = vmatprep.subr.msk.bf16.mxu1 %vm997_vm0, %v4206_v54  ;;  %v3943_v57 = vld [vmem:[#allocation2 + $0x120] ss:$8 sps:$4 sm:$0xff]   ;;  %v3944_v58 = vld [vmem:[#allocation2 + $0x134] ss:$8 sps:$4 sm:$0xff]   ;;  %v3946_v59 = vld [vmem:[#allocation2 + $0x130] ss:$8 sps:$4 sm:$0xff]  }
  0x30   :  { %v3947_v60 = vld [vmem:[#allocation2 + $0x144] ss:$8 sps:$4 sm:$0xff]   ;;  %v3949_v61 = vld [vmem:[#allocation2 + $0x140] ss:$8 sps:$4 sm:$0xff]   ;;  %v3950_v62 = vld [vmem:[#allocation2 + $0x154] ss:$8 sps:$4 sm:$0xff]  }
  0x31   :  { %v3952_v63 = vld [vmem:[#allocation2 + $0x150] ss:$8 sps:$4 sm:$0xff]   ;;  %v3955_v1 = vld [vmem:[#allocation2 + $0x160] ss:$8 sps:$4 sm:$0xff]   ;;  %v3956_v2 = vld [vmem:[#allocation2 + $0x174] ss:$8 sps:$4 sm:$0xff]  }
  0x32   :  { %635 = vmatpush1.bf16.msra.mxu0 %v3876_v7  ;;  %v3958_v3 = vld [vmem:[#allocation2 + $0x170] ss:$8 sps:$4 sm:$0xff]   ;;  %v3959_v4 = vld [vmem:[#allocation2 + $0x184] ss:$8 sps:$4 sm:$0xff]   ;;  %v3961_v5 = vld [vmem:[#allocation2 + $0x180] ss:$8 sps:$4 sm:$0xff]  }
  0x33   :  { %636 = vmatprep.subr.bf16.mxu0 %v4086_v0  ;;  %v3962_v6 = vld [vmem:[#allocation2 + $0x194] ss:$8 sps:$4 sm:$0xff]   ;;  %v3303_v46 = vld [vmem:[%s4607_s4 + $0x8] sm:$0x7] }
  0x36   :  { %637 = vmatpush1.bf16.msra.mxu0 %v3877_v8 }
  0x37   :  { %638 = vmatprep.subr.bf16.mxu0 %v4086_v0 }
  0x3a   :  { %639 = vmatpush1.bf16.msra.mxu0 %v3878_v9 }
  0x3b   :  { %640 = vmatprep.subr.bf16.mxu0 %v4086_v0 }
  0x3e   :  { %641 = vmatpush2.bf16.msra.mxu0 %v3879_v10  ;;  %v3964_v10 = vld [vmem:[#allocation2 + $0x190] ss:$8 sps:$4 sm:$0xff]  }
  0x3f   :  { %642 = vmatprep.subr.bf16.mxu0 %v4086_v0 }
  0x42   :  { %643 = vmatpush2.bf16.msra.mxu0 %v3880_v11  ;;  %v3965_v11 = vld [vmem:[#allocation2 + $0x1a4] ss:$8 sps:$4 sm:$0xff]  }
  0x43   :  { %644 = vmatprep.subr.bf16.mxu0 %v4086_v0 }
  0x46   :  { %645 = vmatpush2.bf16.msra.mxu0 %v3881_v12 }
  0x47   :  { %646 = vmatprep.subr.bf16.mxu0 %v4086_v0 }
  0x4a   :  { %647 = vmatpush2.bf16.msra.mxu0 %v3882_v13 }
  0x4b   :  { %648 = vmatprep.subr.bf16.mxu0 %v4086_v0 }
  0x4e   :  { %649 = vmatpush2.bf16.msra.mxu0 %v3883_v14 }
  0x4f   :  { %650 = vmatprep.subr.bf16.mxu0 %v4086_v0 }
  0x52   :  { %651 = vmatpush2.bf16.msra.mxu0 %v3884_v15 }
  0x53   :  { %652 = vmatprep.subr.bf16.mxu0 %v4086_v0 }
  0x56   :  { %653 = vmatpush2.bf16.msra.mxu0 %v3885_v16  ;;  %v3967_v16 = vld [vmem:[#allocation2 + $0x1a0] ss:$8 sps:$4 sm:$0xff]  }
  0x57   :  { %654 = vmatprep.subr.bf16.mxu0 %v4086_v0  ;;  %v3953_v0 = vld [vmem:[#allocation2 + $0x164] ss:$8 sps:$4 sm:$0xff]  }
  0x5a   :  { %655 = vmatpush2.bf16.msra.mxu0 %v3886_v17  ;;  %v3968_v17 = vld [vmem:[#allocation2 + $0x1b4] ss:$8 sps:$4 sm:$0xff]  }
  0x5d   :  { %657 = vmatmul.mubr.bf16.vlgmr.msra.gmra.mxu0 %v3887_v18 }
  0x5e   :  { %664 = vmatprep.mubr.bf16.mxu0 %v3890_v19 }
  0x65   :  { %665 = vmatmul.mubr.bf16.gmra.mxu0 %v3892_v20 }
  0x66   :  { %672 = vmatprep.mubr.bf16.mxu0 %v3893_v21 }
  0x6d   :  { %673 = vmatmul.mubr.bf16.gmra.mxu0 %v3895_v22  ;;  %v3970_v22 = vld [vmem:[#allocation2 + $0x1b0] ss:$8 sps:$4 sm:$0xff]  }
  0x6e   :  { %680 = vmatprep.mubr.bf16.mxu0 %v3896_v23  ;;  %v3973_v23 = vld [vmem:[#allocation2 + $0x1c4] ss:$8 sps:$4 sm:$0xff]  }
  0x75   :  { %681 = vmatmul.mubr.bf16.gmra.mxu0 %v3898_v24 }
  0x76   :  { %688 = vmatprep.mubr.bf16.mxu0 %v3899_v25 }
  0x7d   :  { %689 = vmatmul.mubr.bf16.gmra.mxu0 %v3901_v26 }
  0x7e   :  { %696 = vmatprep.mubr.bf16.mxu0 %v3902_v27 }
  0x85   :  { %697 = vmatmul.mubr.bf16.gmra.mxu0 %v3904_v28  ;;  %v3971_v28 = vld [vmem:[#allocation2 + $0x1c0] ss:$8 sps:$4 sm:$0xff]  }
  0x86   :  { %704 = vmatprep.mubr.bf16.mxu0 %v3905_v29  ;;  %v3976_v29 = vld [vmem:[#allocation2 + $0x1d4] ss:$8 sps:$4 sm:$0xff]  }
  0x8d   :  { %705 = vmatmul.mubr.bf16.gmra.mxu0 %v3907_v30 }
  0x8e   :  { %712 = vmatprep.mubr.bf16.mxu0 %v3908_v31 }
  0x95   :  { %713 = vmatmul.mubr.bf16.gmra.mxu0 %v3910_v32 }
  0x96   :  { %720 = vmatprep.mubr.bf16.mxu0 %v3911_v33 }
  0x9d   :  { %721 = vmatmul.mubr.bf16.gmra.mxu0 %v3913_v34  ;;  %v3974_v34 = vld [vmem:[#allocation2 + $0x1d0] ss:$8 sps:$4 sm:$0xff]  }
  0x9e   :  { %728 = vmatprep.mubr.bf16.mxu0 %v3914_v35 }
  0xa5   :  { %729 = vmatmul.mubr.bf16.gmra.mxu0 %v3916_v36  ;;  %v3979_v36 = vld [vmem:[#allocation2 + $0x1e4] ss:$8 sps:$4 sm:$0xff]  }
  0xa6   :  { %736 = vmatprep.mubr.bf16.mxu0 %v3917_v37 }
  0xad   :  { %737 = vmatmul.mubr.bf16.gmra.mxu0 %v3919_v38 }
  0xae   :  { %744 = vmatprep.mubr.bf16.mxu0 %v3920_v39 }
  0xb5   :  { %745 = vmatmul.mubr.bf16.gmra.mxu0 %v3922_v40 }
  0xb6   :  { %752 = vmatprep.mubr.bf16.mxu0 %v3923_v41  ;;  %v3977_v41 = vld [vmem:[#allocation2 + $0x1e0] ss:$8 sps:$4 sm:$0xff]  }
  0xbd   :  { %753 = vmatmul.mubr.bf16.gmra.mxu0 %v3925_v42 }
  0xbe   :  { %760 = vmatprep.mubr.bf16.mxu0 %v3926_v43  ;;  %v3982_v43 = vld [vmem:[#allocation2 + $0x1f4] ss:$8 sps:$4 sm:$0xff]  }
  0xc5   :  { %761 = vmatmul.mubr.bf16.gmra.mxu0 %v3928_v44  ;;  %v1079_v44 = vsel %vm997_vm0, %v4206_v54, 0 }
  0xc6   :  { %768 = vmatprep.mubr.bf16.mxu0 %v3929_v45 }
  0xcd   :  { %769 = vmatmul.mubr.bf16.gmra.mxu0 %v3931_v48 }
  0xce   :  { %776 = vmatprep.mubr.bf16.mxu0 %v3932_v49 }
  0xd5   :  { %777 = vmatmul.mubr.bf16.gmra.mxu0 %v3934_v50  ;;  %v3980_v50 = vld [vmem:[#allocation2 + $0x1f0] ss:$8 sps:$4 sm:$0xff]  }
  0xd6   :  { %784 = vmatprep.mubr.bf16.mxu0 %v3935_v51 }
  0xdd   :  { %785 = vmatmul.mubr.bf16.gmra.mxu0 %v3937_v52  ;;  %v3985_v52 = vld [vmem:[#allocation2 + $0x204] ss:$8 sps:$4 sm:$0xff]  }
  0xde   :  { %792 = vmatprep.mubr.bf16.mxu0 %v3938_v53 }
  0xe5   :  { %793 = vmatmul.mubr.bf16.gmra.mxu0 %v3940_v55 }
  0xe6   :  { %800 = vmatprep.mubr.bf16.mxu0 %v3941_v56 }
  0xed   :  { %801 = vmatmul.mubr.bf16.gmra.mxu0 %v3943_v57  ;;  %v3983_v57 = vld [vmem:[#allocation2 + $0x200] ss:$8 sps:$4 sm:$0xff]  }
  0xee   :  { %808 = vmatprep.mubr.bf16.mxu0 %v3944_v58 }
  0xf5   :  { %809 = vmatmul.mubr.bf16.gmra.mxu0 %v3946_v59  ;;  %v3988_v59 = vld [vmem:[#allocation2 + $0x214] ss:$8 sps:$4 sm:$0xff]  }
  0xf6   :  { %816 = vmatprep.mubr.bf16.mxu0 %v3947_v60 }
  0xfd   :  { %817 = vmatmul.mubr.bf16.gmra.mxu0 %v3949_v61 }
  0xfe   :  { %824 = vmatprep.mubr.bf16.mxu0 %v3950_v62 }
 0x105   :  { %825 = vmatmul.mubr.bf16.gmra.mxu0 %v3952_v63 }
 0x106   :  { %832 = vmatprep.mubr.bf16.mxu0 %v3953_v0 }
 0x10d   :  { %833 = vmatmul.mubr.bf16.gmra.mxu0 %v3955_v1  ;;  %v3986_v1 = vld [vmem:[#allocation2 + $0x210] ss:$8 sps:$4 sm:$0xff]  }
 0x10e   :  { %840 = vmatprep.mubr.bf16.mxu0 %v3956_v2 }
 0x115   :  { %841 = vmatmul.mubr.bf16.gmra.mxu0 %v3958_v3  ;;  %v3991_v3 = vld [vmem:[#allocation2 + $0x224] ss:$8 sps:$4 sm:$0xff]  }
 0x116   :  { %848 = vmatprep.mubr.bf16.mxu0 %v3959_v4 }
 0x11d   :  { %v4210_v7 = vpop.f32.mrf.mxu0  ;;  %849 = vmatmul.mubr.bf16.gmra.mxu0 %v3961_v5 }
 0x11e   :  { %856 = vmatprep.mubr.bf16.mxu0 %v3962_v6  ;;  %v1161_v6 = vsel %vm997_vm0, %v3303_v46, 0 }
 0x11f   :  { %v660_v8 = vpop.f32.mrf.mxu0 }
 0x121   :  { %v4212_v9 = vpop.f32.mrf.mxu0 }
 0x122   :  { %v945_v60 = vpack.c.bf16 %v4212_v9, %v4210_v7  ;;  %v3308_v7 = vld [vmem:[%s4607_s4 + $0xc] sm:$0x7] }
 0x123   :  { %v663_v12 = vpop.f32.mrf.mxu0 }
 0x125   :  { %v4214_v13 = vpop.f32.mrf.mxu0  ;;  %857 = vmatmul.mubr.bf16.gmra.mxu0 %v3964_v10 }
 0x126   :  { %864 = vmatprep.mubr.bf16.mxu0 %v3965_v11  ;;  %v3989_v11 = vld [vmem:[#allocation2 + $0x220] ss:$8 sps:$4 sm:$0xff]  }
 0x127   :  { %v668_v14 = vpop.f32.mrf.mxu0 }
 0x129   :  { %v4216_v15 = vpop.f32.mrf.mxu0 }
 0x12a   :  { %v946_v2 = vpack.c.bf16 %v4216_v15, %v4214_v13  ;;  %v3994_v13 = vld [vmem:[#allocation2 + $0x234] ss:$8 sps:$4 sm:$0xff]  }
 0x12b   :  { %v671_v18 = vpop.f32.mrf.mxu0 }
 0x12d   :  { %v4218_v19 = vpop.f32.mrf.mxu0  ;;  %865 = vmatmul.mubr.bf16.gmra.mxu0 %v3967_v16 }
 0x12e   :  { %872 = vmatprep.mubr.bf16.mxu0 %v3968_v17 }
 0x12f   :  { %v676_v20 = vpop.f32.mrf.mxu0 }
 0x131   :  { %v4220_v21 = vpop.f32.mrf.mxu0 }
 0x132   :  { %v947_v4 = vpack.c.bf16 %v4220_v21, %v4218_v19  ;;  %v3992_v19 = vld [vmem:[#allocation2 + $0x230] ss:$8 sps:$4 sm:$0xff]  }
 0x133   :  { %v679_v24 = vpop.f32.mrf.mxu0 }
 0x134   :  { %v3313_v24 = vld [vmem:[%s4607_s4 + $0x10] sm:$0x7] }
 0x135   :  { %v4222_v25 = vpop.f32.mrf.mxu0  ;;  %873 = vmatmul.mubr.bf16.gmra.mxu0 %v3970_v22 }
 0x136   :  { %880 = vmatprep.mubr.bf16.mxu0 %v3973_v23  ;;  %v1251_v23 = vsel %vm997_vm0, %v3308_v7, 0 }
 0x137   :  { %v684_v26 = vpop.f32.mrf.mxu0 }
 0x139   :  { %v4224_v27 = vpop.f32.mrf.mxu0 }
 0x13a   :  { %v948_v12 = vpack.c.bf16 %v4224_v27, %v4222_v25 }
 0x13b   :  { %v687_v30 = vpop.f32.mrf.mxu0 }
 0x13d   :  { %v690_v31 = vpop.f32.mrf.mxu0  ;;  %881 = vmatmul.mubr.bf16.gmra.mxu0 %v3971_v28 }
 0x13e   :  { %888 = vmatprep.mubr.bf16.mxu0 %v3976_v29 }
 0x13f   :  { %v692_v32 = vpop.f32.mrf.mxu0 }
 0x141   :  { %v693_v33 = vpop.f32.mrf.mxu0 }
 0x142   :  { %v949_v35 = vpack.c.bf16 %v693_v33, %v690_v31 }
 0x143   :  { %v695_v37 = vpop.f32.mrf.mxu0 }
 0x144   :  { %3573 = vmatprep.mubr.msk.bf16.mxu1 %vm984_vm1, %v949_v35 }
 0x145   :  { %v698_v38 = vpop.f32.mrf.mxu0  ;;  %889 = vmatmul.mubr.bf16.gmra.mxu0 %v3974_v34 }
 0x146   :  { %896 = vmatprep.mubr.bf16.mxu0 %v3979_v36 }
 0x147   :  { %v700_v39 = vpop.f32.mrf.mxu0 }
 0x148   :  { %v1341_v39 = vsel %vm997_vm0, %v3313_v24, 0 }
 0x149   :  { %v701_v40 = vpop.f32.mrf.mxu0 }
 0x14a   :  { %v950_v42 = vpack.c.bf16 %v701_v40, %v698_v38 }
 0x14b   :  { %v703_v45 = vpop.f32.mrf.mxu0 }
 0x14c   :  { %3574 = vmatmul.mubr.msk.bf16.vlgmr.msra.gmra.mxu1 %vm984_vm1, %v950_v42 }
 0x14d   :  { %v706_v47 = vpop.f32.mrf.mxu0  ;;  %897 = vmatmul.mubr.bf16.gmra.mxu0 %v3977_v41  ;;  %3582 = vmatpush3.bf16.msra.mxu1 %v1079_v44  ;;  %v3318_v41 = vld [vmem:[%s4607_s4 + $0x14] sm:$0x7] }
 0x14e   :  { %904 = vmatprep.mubr.bf16.mxu0 %v3982_v43  ;;  %3855 = vmatprep.subr.msk.bf16.mxu1 %vm997_vm0, %v3303_v46 }
 0x14f   :  { %v708_v48 = vpop.f32.mrf.mxu0 }
 0x151   :  { %v709_v49 = vpop.f32.mrf.mxu0 }
 0x152   :  { %v951_v51 = vpack.c.bf16 %v709_v49, %v706_v47 }
 0x153   :  { %v711_v53 = vpop.f32.mrf.mxu0 }
 0x154   :  { %3577 = vmatprep.mubr.msk.bf16.mxu1 %vm984_vm1, %v951_v51 }
 0x155   :  { %v714_v54 = vpop.f32.mrf.mxu0  ;;  %905 = vmatmul.mubr.bf16.gmra.mxu0 %v3980_v50 }
 0x156   :  { %912 = vmatprep.mubr.bf16.mxu0 %v3985_v52 }
 0x157   :  { %v716_v55 = vpop.f32.mrf.mxu0 }
 0x159   :  { %v717_v56 = vpop.f32.mrf.mxu0 }
 0x15a   :  { %v952_v58 = vpack.c.bf16 %v717_v56, %v714_v54 }
 0x15b   :  { %v719_v61 = vpop.f32.mrf.mxu0 }
 0x15c   :  { %3578 = vmatmul.mubr.msk.bf16.gmra.mxu1 %vm984_vm1, %v952_v58  ;;  %v1431_v61 = vsel %vm997_vm0, %v3318_v41, 0 }
 0x15d   :  { %v722_v62 = vpop.f32.mrf.mxu0  ;;  %913 = vmatmul.mubr.bf16.gmra.mxu0 %v3983_v57  ;;  %3583 = vmatprep.mubr.msk.bf16.mxu1 %vm984_vm1, %v945_v60 }
 0x15e   :  { %920 = vmatprep.mubr.bf16.mxu0 %v3988_v59 }
 0x15f   :  { %v724_v63 = vpop.f32.mrf.mxu0 }
 0x160   :  { %v3323_v63 = vld [vmem:[%s4607_s4 + $0x18] sm:$0x7] }
 0x161   :  { %v725_v0 = vpop.f32.mrf.mxu0 }
 0x162   :  { %v953_v14 = vpack.c.bf16 %v725_v0, %v722_v62 }
 0x163   :  { %v727_v5 = vpop.f32.mrf.mxu0 }
 0x164   :  { %3584 = vmatmul.mubr.msk.bf16.vlgmr.msra.gmra.mxu1 %vm984_vm1, %v946_v2 }
 0x165   :  { %v730_v8 = vpop.f32.mrf.mxu0  ;;  %921 = vmatmul.mubr.bf16.gmra.mxu0 %v3986_v1  ;;  %3587 = vmatprep.mubr.msk.bf16.mxu1 %vm984_vm1, %v947_v4 }
 0x166   :  { %928 = vmatprep.mubr.bf16.mxu0 %v3991_v3  ;;  %3592 = vmatpush3.bf16.msra.mxu1 %v1161_v6 }
 0x167   :  { %v732_v9 = vpop.f32.mrf.mxu0  ;;  %3856 = vmatprep.subr.msk.bf16.mxu1 %vm997_vm0, %v3308_v7 }
 0x169   :  { %v733_v10 = vpop.f32.mrf.mxu0 }
 0x16a   :  { %v954_v20 = vpack.c.bf16 %v733_v10, %v730_v8 }
 0x16b   :  { %v735_v15 = vpop.f32.mrf.mxu0 }
 0x16c   :  { %3588 = vmatmul.mubr.msk.bf16.gmra.mxu1 %vm984_vm1, %v948_v12 }
 0x16d   :  { %v738_v16 = vpop.f32.mrf.mxu0  ;;  %929 = vmatmul.mubr.bf16.gmra.mxu0 %v3989_v11  ;;  %3593 = vmatprep.mubr.msk.bf16.mxu1 %vm984_vm1, %v953_v14 }
 0x16e   :  { %936 = vmatprep.mubr.bf16.mxu0 %v3994_v13 }
 0x16f   :  { %v740_v17 = vpop.f32.mrf.mxu0 }
 0x171   :  { %v741_v18 = vpop.f32.mrf.mxu0 }
 0x172   :  { %v955_v21 = vpack.c.bf16 %v741_v18, %v738_v16 }
 0x173   :  { %v743_v22 = vpop.f32.mrf.mxu0 }
 0x174   :  { %3594 = vmatmul.mubr.msk.bf16.vlgmr.msra.gmra.mxu1 %vm984_vm1, %v954_v20 }
 0x175   :  { %v746_v25 = vpop.f32.mrf.mxu0  ;;  %937 = vmatmul.mubr.bf16.gmra.mxu0 %v3992_v19  ;;  %3597 = vmatprep.mubr.msk.bf16.mxu1 %vm984_vm1, %v955_v21  ;;  %v1521_v19 = vsel %vm997_vm0, %v3323_v63, 0  ;;  %v3328_v21 = vld [vmem:[%s4607_s4 + $0x1c] sm:$0x7] }
 0x176   :  { %3602 = vmatpush3.bf16.msra.mxu1 %v1251_v23 }
 0x177   :  { %v748_v26 = vpop.f32.mrf.mxu0  ;;  %3857 = vmatprep.subr.msk.bf16.mxu1 %vm997_vm0, %v3313_v24 }
 0x179   :  { %v749_v27 = vpop.f32.mrf.mxu0 }
 0x17a   :  { %v956_v28 = vpack.c.bf16 %v749_v27, %v746_v25 }
 0x17b   :  { %v751_v29 = vpop.f32.mrf.mxu0 }
 0x17c   :  { %3598 = vmatmul.mubr.msk.bf16.gmra.mxu1 %vm984_vm1, %v956_v28 }
 0x17d   :  { %v754_v30 = vpop.f32.mrf.mxu0 }
 0x17f   :  { %v756_v31 = vpop.f32.mrf.mxu0 }
 0x181   :  { %v757_v32 = vpop.f32.mrf.mxu0 }
 0x182   :  { %v957_v33 = vpack.c.bf16 %v757_v32, %v754_v30 }
 0x183   :  { %v759_v34 = vpop.f32.mrf.mxu0 }
 0x184   :  { %3603 = vmatprep.mubr.msk.bf16.mxu1 %vm984_vm1, %v957_v33 }
 0x185   :  { %v762_v35 = vpop.f32.mrf.mxu0 }
 0x187   :  { %v764_v36 = vpop.f32.mrf.mxu0 }
 0x189   :  { %v765_v37 = vpop.f32.mrf.mxu0 }
 0x18a   :  { %v958_v38 = vpack.c.bf16 %v765_v37, %v762_v35 }
 0x18b   :  { %v767_v40 = vpop.f32.mrf.mxu0 }
 0x18c   :  { %3604 = vmatmul.mubr.msk.bf16.vlgmr.msra.gmra.mxu1 %vm984_vm1, %v958_v38 }
 0x18d   :  { %v770_v42 = vpop.f32.mrf.mxu0  ;;  %3612 = vmatpush3.bf16.msra.mxu1 %v1341_v39 }
 0x18e   :  { %3858 = vmatprep.subr.msk.bf16.mxu1 %vm997_vm0, %v3318_v41  ;;  %v1611_v41 = vsel %vm997_vm0, %v3328_v21, 0 }
 0x18f   :  { %v772_v43 = vpop.f32.mrf.mxu0 }
 0x190   :  { %v3333_v43 = vld [vmem:[%s4607_s4 + $0x20] sm:$0x7] }
 0x191   :  { %v773_v44 = vpop.f32.mrf.mxu0 }
 0x192   :  { %v959_v45 = vpack.c.bf16 %v773_v44, %v770_v42 }
 0x193   :  { %v775_v46 = vpop.f32.mrf.mxu0 }
 0x194   :  { %3607 = vmatprep.mubr.msk.bf16.mxu1 %vm984_vm1, %v959_v45 }
 0x195   :  { %v778_v47 = vpop.f32.mrf.mxu0 }
 0x197   :  { %v780_v48 = vpop.f32.mrf.mxu0 }
 0x199   :  { %v781_v49 = vpop.f32.mrf.mxu0 }
 0x19a   :  { %v960_v50 = vpack.c.bf16 %v781_v49, %v778_v47 }
 0x19b   :  { %v783_v51 = vpop.f32.mrf.mxu0 }
 0x19c   :  { %3608 = vmatmul.mubr.msk.bf16.gmra.mxu1 %vm984_vm1, %v960_v50 }
 0x19d   :  { %v786_v52 = vpop.f32.mrf.mxu0 }
 0x19f   :  { %v788_v53 = vpop.f32.mrf.mxu0 }
 0x1a1   :  { %v789_v54 = vpop.f32.mrf.mxu0 }
 0x1a2   :  { %v961_v55 = vpack.c.bf16 %v789_v54, %v786_v52 }
 0x1a3   :  { %v791_v56 = vpop.f32.mrf.mxu0 }
 0x1a4   :  { %3613 = vmatprep.mubr.msk.bf16.mxu1 %vm984_vm1, %v961_v55 }
 0x1a5   :  { %v794_v57 = vpop.f32.mrf.mxu0 }
 0x1a7   :  { %v796_v58 = vpop.f32.mrf.mxu0 }
 0x1a9   :  { %v797_v59 = vpop.f32.mrf.mxu0 }
 0x1aa   :  { %v962_v60 = vpack.c.bf16 %v797_v59, %v794_v57 }
 0x1ab   :  { %v799_v62 = vpop.f32.mrf.mxu0 }
 0x1ac   :  { %3614 = vmatmul.mubr.msk.bf16.vlgmr.msra.gmra.mxu1 %vm984_vm1, %v962_v60 }
 0x1ad   :  { %v802_v0 = vpop.f32.mrf.mxu0  ;;  %3622 = vmatpush3.bf16.msra.mxu1 %v1431_v61 }
 0x1ae   :  { %3859 = vmatprep.subr.msk.bf16.mxu1 %vm997_vm0, %v3323_v63  ;;  %v1701_v63 = vsel %vm997_vm0, %v3333_v43, 0 }
 0x1af   :  { %v804_v1 = vpop.f32.mrf.mxu0 }
 0x1b1   :  { %v805_v2 = vpop.f32.mrf.mxu0 }
 0x1b2   :  { %v963_v3 = vpack.c.bf16 %v805_v2, %v802_v0 }
 0x1b3   :  { %v807_v4 = vpop.f32.mrf.mxu0 }
 0x1b4   :  { %3617 = vmatprep.mubr.msk.bf16.mxu1 %vm984_vm1, %v963_v3 }
 0x1b5   :  { %v810_v5 = vpop.f32.mrf.mxu0 }
 0x1b7   :  { %v812_v6 = vpop.f32.mrf.mxu0 }
 0x1b9   :  { %v813_v7 = vpop.f32.mrf.mxu0 }
 0x1ba   :  { %v964_v8 = vpack.c.bf16 %v813_v7, %v810_v5 }
 0x1bb   :  { %v815_v9 = vpop.f32.mrf.mxu0 }
 0x1bc   :  { %3618 = vmatmul.mubr.msk.bf16.gmra.mxu1 %vm984_vm1, %v964_v8 }
 0x1bd   :  { %v818_v10 = vpop.f32.mrf.mxu0 }
 0x1bf   :  { %v820_v11 = vpop.f32.mrf.mxu0 }
 0x1c1   :  { %v821_v12 = vpop.f32.mrf.mxu0 }
 0x1c2   :  { %v965_v13 = vpack.c.bf16 %v821_v12, %v818_v10 }
 0x1c3   :  { %v823_v14 = vpop.f32.mrf.mxu0 }
 0x1c4   :  { %3623 = vmatprep.mubr.msk.bf16.mxu1 %vm984_vm1, %v965_v13 }
 0x1c5   :  { %v826_v15 = vpop.f32.mrf.mxu0 }
 0x1c7   :  { %v828_v16 = vpop.f32.mrf.mxu0 }
 0x1c9   :  { %v829_v17 = vpop.f32.mrf.mxu0 }
 0x1ca   :  { %v966_v18 = vpack.c.bf16 %v829_v17, %v826_v15 }
 0x1cb   :  { %v831_v20 = vpop.f32.mrf.mxu0 }
 0x1cc   :  { %3624 = vmatmul.mubr.msk.bf16.vlgmr.msra.gmra.mxu1 %vm984_vm1, %v966_v18 }
 0x1cd   :  { %v834_v22 = vpop.f32.mrf.mxu0  ;;  %3632 = vmatpush3.bf16.msra.mxu1 %v1521_v19 }
 0x1ce   :  { %3860 = vmatprep.subr.msk.bf16.mxu1 %vm997_vm0, %v3328_v21 }
 0x1cf   :  { %v836_v23 = vpop.f32.mrf.mxu0 }
 0x1d1   :  { %v837_v24 = vpop.f32.mrf.mxu0 }
 0x1d2   :  { %v967_v25 = vpack.c.bf16 %v837_v24, %v834_v22 }
 0x1d3   :  { %v839_v26 = vpop.f32.mrf.mxu0 }
 0x1d4   :  { %3627 = vmatprep.mubr.msk.bf16.mxu1 %vm984_vm1, %v967_v25 }
 0x1d5   :  { %v842_v27 = vpop.f32.mrf.mxu0 }
 0x1d7   :  { %v844_v28 = vpop.f32.mrf.mxu0 }
 0x1d9   :  { %v845_v29 = vpop.f32.mrf.mxu0 }
 0x1da   :  { %v968_v30 = vpack.c.bf16 %v845_v29, %v842_v27 }
 0x1db   :  { %v847_v31 = vpop.f32.mrf.mxu0 }
 0x1dc   :  { %3628 = vmatmul.mubr.msk.bf16.gmra.mxu1 %vm984_vm1, %v968_v30 }
 0x1dd   :  { %v850_v32 = vpop.f32.mrf.mxu0 }
 0x1df   :  { %v852_v33 = vpop.f32.mrf.mxu0 }
 0x1e1   :  { %v853_v34 = vpop.f32.mrf.mxu0 }
 0x1e2   :  { %v969_v35 = vpack.c.bf16 %v853_v34, %v850_v32 }
 0x1e3   :  { %v855_v36 = vpop.f32.mrf.mxu0 }
 0x1e4   :  { %3633 = vmatprep.mubr.msk.bf16.mxu1 %vm984_vm1, %v969_v35 }
 0x1e5   :  { %v858_v37 = vpop.f32.mrf.mxu0 }
 0x1e7   :  { %v860_v38 = vpop.f32.mrf.mxu0 }
 0x1e9   :  { %v861_v39 = vpop.f32.mrf.mxu0 }
 0x1ea   :  { %v970_v40 = vpack.c.bf16 %v861_v39, %v858_v37 }
 0x1eb   :  { %v863_v42 = vpop.f32.mrf.mxu0 }
 0x1ec   :  { %3634 = vmatmul.mubr.msk.bf16.vlgmr.msra.gmra.mxu1 %vm984_vm1, %v970_v40 }
 0x1ed   :  { %v866_v44 = vpop.f32.mrf.mxu0  ;;  %3642 = vmatpush3.bf16.msra.mxu1 %v1611_v41 }
 0x1ee   :  { %3861 = vmatprep.subr.msk.bf16.mxu1 %vm997_vm0, %v3333_v43 }
 0x1ef   :  { %v868_v45 = vpop.f32.mrf.mxu0 }
 0x1f1   :  { %v869_v46 = vpop.f32.mrf.mxu0 }
 0x1f2   :  { %v971_v47 = vpack.c.bf16 %v869_v46, %v866_v44 }
 0x1f3   :  { %v871_v48 = vpop.f32.mrf.mxu0 }
 0x1f4   :  { %3637 = vmatprep.mubr.msk.bf16.mxu1 %vm984_vm1, %v971_v47 }
 0x1f5   :  { %v874_v49 = vpop.f32.mrf.mxu0 }
 0x1f7   :  { %v876_v50 = vpop.f32.mrf.mxu0 }
 0x1f9   :  { %v877_v51 = vpop.f32.mrf.mxu0 }
 0x1fa   :  { %v972_v52 = vpack.c.bf16 %v877_v51, %v874_v49 }
 0x1fb   :  { %v879_v53 = vpop.f32.mrf.mxu0 }
 0x1fc   :  { %3638 = vmatmul.mubr.msk.bf16.gmra.mxu1 %vm984_vm1, %v972_v52 }
 0x1fd   :  { %v882_v54 = vpop.f32.mrf.mxu0 }
 0x1ff   :  { %v884_v55 = vpop.f32.mrf.mxu0 }
 0x201   :  { %v885_v56 = vpop.f32.mrf.mxu0 }
 0x202   :  { %v973_v57 = vpack.c.bf16 %v885_v56, %v882_v54 }
 0x203   :  { %v887_v58 = vpop.f32.mrf.mxu0 }
 0x204   :  { %3643 = vmatprep.mubr.msk.bf16.mxu1 %vm984_vm1, %v973_v57 }
 0x205   :  { %v890_v59 = vpop.f32.mrf.mxu0 }
 0x207   :  { %v892_v60 = vpop.f32.mrf.mxu0 }
 0x209   :  { %v893_v61 = vpop.f32.mrf.mxu0 }
 0x20a   :  { %v974_v62 = vpack.c.bf16 %v893_v61, %v890_v59 }
 0x20b   :  { %v895_v0 = vpop.f32.mrf.mxu0 }
 0x20c   :  { %3644 = vmatmul.mubr.msk.bf16.vlgmr.msra.gmra.mxu1 %vm984_vm1, %v974_v62  ;;  %v3575_v2 = vpop.f32.mrf.mxu1 }
 0x20d   :  { %v898_v1 = vpop.f32.mrf.mxu0  ;;  %3652 = vmatpush3.bf16.msra.mxu1 %v1701_v63 }
 0x20e   :  { %v1035_v5 = vpop.f32.mrf.mxu1 }
 0x20f   :  { %v900_v3 = vpop.f32.mrf.mxu0 }
 0x210   :  { %v3576_v9 = vpop.f32.mrf.mxu1 }
 0x211   :  { %v901_v4 = vpop.f32.mrf.mxu0 }
 0x212   :  { %v975_v6 = vpack.c.bf16 %v901_v4, %v898_v1  ;;  %v4302_v12 = vpop.f32.mrf.mxu1 }
 0x213   :  { %v903_v7 = vpop.f32.mrf.mxu0 }
 0x214   :  { %3647 = vmatprep.mubr.msk.bf16.mxu1 %vm984_vm1, %v975_v6 }
 0x215   :  { %v906_v8 = vpop.f32.mrf.mxu0 }
 0x217   :  { %v908_v10 = vpop.f32.mrf.mxu0 }
 0x219   :  { %v909_v11 = vpop.f32.mrf.mxu0 }
 0x21a   :  { %v976_v13 = vpack.c.bf16 %v909_v11, %v906_v8 }
 0x21b   :  { %v911_v14 = vpop.f32.mrf.mxu0 }
 0x21c   :  { %v3579_v15 = vpop.f32.mrf.mxu1  ;;  %3648 = vmatmul.mubr.msk.bf16.gmra.mxu1 %vm984_vm1, %v976_v13 }
 0x21d   :  { %v914_v16 = vpop.f32.mrf.mxu0 }
 0x21e   :  { %v1051_v17 = vpop.f32.mrf.mxu1 }
 0x21f   :  { %v916_v18 = vpop.f32.mrf.mxu0 }
 0x220   :  { %v3580_v19 = vpop.f32.mrf.mxu1 }
 0x221   :  { %v917_v20 = vpop.f32.mrf.mxu0 }
 0x222   :  { %v977_v21 = vpack.c.bf16 %v917_v20, %v914_v16  ;;  %v4305_v22 = vpop.f32.mrf.mxu1 }
 0x223   :  { %v919_v23 = vpop.f32.mrf.mxu0 }
 0x224   :  { %v3585_v24 = vpop.f32.mrf.mxu1  ;;  %3653 = vmatprep.mubr.msk.bf16.mxu1 %vm984_vm1, %v977_v21 }
 0x225   :  { %v1124_v25 = vadd.f32 %v3585_v24, %v3575_v2  ;;  %v922_v26 = vpop.f32.mrf.mxu0 }
 0x226   :  { %v1115_v27 = vpop.f32.mrf.mxu1 }
 0x227   :  { %v1116_v28 = vadd.f32 %v1115_v27, %v1035_v5  ;;  %v924_v29 = vpop.f32.mrf.mxu0 }
 0x228   :  { %v3586_v30 = vpop.f32.mrf.mxu1  ;;  %v4087_v29 = vmov 0.0  }
 0x229   :  { %v1127_v31 = vadd.f32 %v3586_v30, %v3576_v9  ;;  %v925_v32 = vpop.f32.mrf.mxu0  ;;  %3661 = vmatprep.subr.bf16.mxu1 %v4087_v29  ;;  %3805 = vmatprep.subr.bf16.mxu0 %v4087_v29 }
 0x22a   :  { %v978_v33 = vpack.c.bf16 %v925_v32, %v922_v26  ;;  %v4308_v34 = vpop.f32.mrf.mxu1  ;;  %3809 = vmatprep.mubr.msk.bf16.mxu0 %vm4088_vm2, %v4087_v29 }
 0x22b   :  { %v927_v35 = vpop.f32.mrf.mxu0 }
 0x22c   :  { %v3589_v36 = vpop.f32.mrf.mxu1  ;;  %3654 = vmatmul.mubr.msk.bf16.vlgmr.msra.gmra.mxu1 %vm984_vm1, %v978_v33 }
 0x22d   :  { %v1140_v37 = vadd.f32 %v3589_v36, %v3579_v15  ;;  %v930_v38 = vpop.f32.mrf.mxu0 }
 0x22e   :  { %v1131_v39 = vpop.f32.mrf.mxu1 }
 0x22f   :  { %v1132_v40 = vadd.f32 %v1131_v39, %v1051_v17  ;;  %v932_v41 = vpop.f32.mrf.mxu0 }
 0x230   :  { %v3590_v42 = vpop.f32.mrf.mxu1 }
 0x231   :  { %v1143_v43 = vadd.f32 %v3590_v42, %v3580_v19  ;;  %v933_v44 = vpop.f32.mrf.mxu0 }
 0x232   :  { %v979_v45 = vpack.c.bf16 %v933_v44, %v930_v38  ;;  %v4311_v46 = vpop.f32.mrf.mxu1 }
 0x233   :  { %v935_v47 = vpop.f32.mrf.mxu0 }
 0x234   :  { %v3595_v48 = vpop.f32.mrf.mxu1  ;;  %3657 = vmatprep.mubr.msk.bf16.mxu1 %vm984_vm1, %v979_v45 }
 0x235   :  { %v1230_v49 = vadd.f32 %v3595_v48, %v1124_v25  ;;  %v938_v50 = vpop.f32.mrf.mxu0 }
 0x236   :  { %v1197_v51 = vpop.f32.mrf.mxu1 }
 0x237   :  { %v1228_v52 = vadd.f32 %v1197_v51, %v1116_v28  ;;  %v940_v53 = vpop.f32.mrf.mxu0 }
 0x238   :  { %v3596_v54 = vpop.f32.mrf.mxu1 }
 0x239   :  { %v1231_v55 = vadd.f32 %v3596_v54, %v1127_v31  ;;  %v941_v56 = vpop.f32.mrf.mxu0 }
 0x23a   :  { %v980_v57 = vpack.c.bf16 %v941_v56, %v938_v50  ;;  %v4314_v58 = vpop.f32.mrf.mxu1 }
 0x23b   :  { %v943_v59 = vpop.f32.mrf.mxu0 }
 0x23c   :  { %v3599_v60 = vpop.f32.mrf.mxu1  ;;  %3658 = vmatmul.mubr.msk.bf16.gmra.mxu1 %vm984_vm1, %v980_v57 }
 0x23d   :  { %v1234_v61 = vadd.f32 %v3599_v60, %v1140_v37  ;;  %3669 = vmatprep.mubr.msk.bf16.mxu1 %vm4088_vm2, %v4087_v29 }
 0x23e   :  { %v1213_v62 = vpop.f32.mrf.mxu1 }
 0x23f   :  { %v1232_v63 = vadd.f32 %v1213_v62, %v1132_v40 }
 0x240   :  { %v3600_v0 = vpop.f32.mrf.mxu1 }
 0x241   :  { %v1235_v1 = vadd.f32 %v3600_v0, %v1143_v43 }
 0x242   :  { %v4317_v2 = vpop.f32.mrf.mxu1 }
 0x24c   :  { %v3605_v3 = vpop.f32.mrf.mxu1 }
 0x24d   :  { %v1320_v4 = vadd.f32 %v3605_v3, %v1230_v49  ;;  %v3338_v3 = vld [vmem:[%s4610_s7] ss:$0 sm:$0xff] }
 0x24e   :  { %v1287_v5 = vpop.f32.mrf.mxu1 }
 0x24f   :  { %v1318_v6 = vadd.f32 %v1287_v5, %v1228_v52 }
 0x250   :  { %v3606_v7 = vpop.f32.mrf.mxu1 }
 0x251   :  { %v1321_v8 = vadd.f32 %v3606_v7, %v1231_v55 }
 0x252   :  { %v4319_v9 = vpop.f32.mrf.mxu1 }
 0x25c   :  { %v3609_v10 = vpop.f32.mrf.mxu1 }
 0x25d   :  { %v4321_v11 = vadd.f32 %v3609_v10, %v1234_v61 }
 0x25e   :  { %v1303_v13 = vpop.f32.mrf.mxu1 }
 0x25f   :  { %v4323_v14 = vadd.f32 %v1303_v13, %v1232_v63  ;;  %v1135_v13 = vadd.f32 %v4311_v46, %v4305_v22 }
 0x260   :  { %v3610_v15 = vpop.f32.mrf.mxu1 }
 0x261   :  { %v4325_v16 = vadd.f32 %v3610_v15, %v1235_v1 }
 0x262   :  { %v4327_v17 = vpop.f32.mrf.mxu1 }
 0x26c   :  { %v3615_v18 = vpop.f32.mrf.mxu1 }
 0x26d   :  { %v1410_v19 = vadd.f32 %v3615_v18, %v1320_v4 }
 0x26e   :  { %v1377_v20 = vpop.f32.mrf.mxu1 }
 0x26f   :  { %v1408_v21 = vadd.f32 %v1377_v20, %v1318_v6  ;;  %v1233_v20 = vadd.f32 %v4317_v2, %v1135_v13  ;;  %v4000_v13 = vld [vmem:[%s4605_s2 + $0x28] sm:$0xff]  }
 0x270   :  { %v3616_v23 = vpop.f32.mrf.mxu1 }
 0x271   :  { %v1411_v24 = vadd.f32 %v3616_v23, %v1321_v8 }
 0x272   :  { %v4329_v25 = vpop.f32.mrf.mxu1 }
 0x27c   :  { %v3619_v26 = vpop.f32.mrf.mxu1 }
 0x27d   :  { %v1414_v15 = vadd.f32 %v3619_v26, %v4321_v11 }
 0x27e   :  { %v1393_v27 = vpop.f32.mrf.mxu1 }
 0x280   :  { %v3620_v28 = vpop.f32.mrf.mxu1 }
 0x282   :  { %v1396_v30 = vpop.f32.mrf.mxu1 }
 0x28c   :  { %v3625_v31 = vpop.f32.mrf.mxu1 }
 0x28d   :  { %v1500_v57 = vadd.f32 %v3625_v31, %v1410_v19  ;;  %v1323_v31 = vadd.f32 %v4327_v17, %v1233_v20 }
 0x28e   :  { %v1467_v32 = vpop.f32.mrf.mxu1 }
 0x28f   :  { %v4333_v33 = vadd.f32 %v1467_v32, %v1408_v21  ;;  %v1412_v32 = vadd.f32 %v1393_v27, %v4323_v14  ;;  %v1413_v11 = vadd.f32 %v1396_v30, %v1323_v31 }
 0x290   :  { %v3626_v35 = vpop.f32.mrf.mxu1 }
 0x291   :  { %v1501_v61 = vadd.f32 %v3626_v35, %v1411_v24  ;;  %v1119_v24 = vadd.f32 %v4308_v34, %v4302_v12  ;;  %v1415_v35 = vadd.f32 %v3620_v28, %v4325_v16 }
 0x292   :  { %v4339_v36 = vpop.f32.mrf.mxu1 }
 0x293   :  { %v1229_v22 = vadd.f32 %v4314_v58, %v1119_v24 }
 0x295   :  { %v1319_v2 = vadd.f32 %v4319_v9, %v1229_v22 }
 0x297   :  { %v1409_v17 = vadd.f32 %v4329_v25, %v1319_v2 }
 0x299   :  { %v1499_v58 = vadd.f32 %v4339_v36, %v1409_v17 }
 0x29c   :  { %v3629_v37 = vpop.f32.mrf.mxu1 }
 0x29d   :  { %v1504_v21 = vadd.f32 %v3629_v37, %v1414_v15  ;;  %v4001_v15 = vld [vmem:[%s4605_s2 + $0x30] sm:$0xff]  }
 0x29e   :  { %v1483_v38 = vpop.f32.mrf.mxu1 }
 0x29f   :  { %v1502_v26 = vadd.f32 %v1483_v38, %v1412_v32 }
 0x2a0   :  { %v3630_v39 = vpop.f32.mrf.mxu1 }
 0x2a2   :  { %v1486_v40 = vpop.f32.mrf.mxu1 }
 0x2ac   :  { %v3635_v41 = vpop.f32.mrf.mxu1 }
 0x2ad   :  { %v1590_v59 = vadd.f32 %v3635_v41, %v1500_v57 }
 0x2ae   :  { %v4341_v42 = vpop.f32.mrf.mxu1 }
 0x2b0   :  { %v3636_v43 = vpop.f32.mrf.mxu1 }
 0x2b1   :  { %v1591_v0 = vadd.f32 %v3636_v43, %v1501_v61  ;;  %v1505_v43 = vadd.f32 %v3630_v39, %v1415_v35 }
 0x2b2   :  { %v1560_v44 = vpop.f32.mrf.mxu1 }
 0x2bc   :  { %v3639_v45 = vpop.f32.mrf.mxu1 }
 0x2bd   :  { %v1594_v41 = vadd.f32 %v3639_v45, %v1504_v21 }
 0x2be   :  { %v1573_v47 = vpop.f32.mrf.mxu1 }
 0x2bf   :  { %v1592_v57 = vadd.f32 %v1573_v47, %v1502_v26  ;;  %v1588_v47 = vadd.f32 %v4341_v42, %v4333_v33 }
 0x2c0   :  { %v3640_v48 = vpop.f32.mrf.mxu1 }
 0x2c1   :  { %v1595_v12 = vadd.f32 %v3640_v48, %v1505_v43 }
 0x2c2   :  { %v1576_v49 = vpop.f32.mrf.mxu1 }
 0x2cc   :  { %v3645_v50 = vpop.f32.mrf.mxu1 }
 0x2cd   :  { %v1680_v62 = vadd.f32 %v3645_v50, %v1590_v59  ;;  %v1589_v59 = vadd.f32 %v1560_v44, %v1499_v58  ;;  %v4008_v58 = vld [vmem:[%s4608_s5 + $0x20] sm:$0xff]  }
 0x2ce   :  { %v4343_v51 = vpop.f32.mrf.mxu1 }
 0x2d0   :  { %v3646_v52 = vpop.f32.mrf.mxu1 }
 0x2d1   :  { %v1681_v5 = vadd.f32 %v3646_v52, %v1591_v0  ;;  %v1503_v52 = vadd.f32 %v1486_v40, %v1413_v11 }
 0x2d2   :  { %v1650_v53 = vpop.f32.mrf.mxu1 }
 0x2d3   :  { %v1593_v27 = vadd.f32 %v1576_v49, %v1503_v52  ;;  %v1679_v48 = vadd.f32 %v1650_v53, %v1589_v59  ;;  %v3995_v53 = vld [vmem:[%s4605_s2] sm:$0xff]   ;;  %v4009_v59 = vld [vmem:[%s4608_s5 + $0x28] sm:$0xff]  }
 0x2dc   :  { %v3649_v54 = vpop.f32.mrf.mxu1 }
 0x2dd   :  { %v1684_v50 = vadd.f32 %v3649_v54, %v1594_v41  ;;  %v4005_v41 = vld [vmem:[%s4608_s5] sm:$0xff]  }
 0x2de   :  { %v1663_v55 = vpop.f32.mrf.mxu1 }
 0x2df   :  { %v1682_v16 = vadd.f32 %v1663_v55, %v1592_v57 }
 0x2e0   :  { %v3650_v56 = vpop.f32.mrf.mxu1 }
 0x2e1   :  { %v1685_v28 = vadd.f32 %v3650_v56, %v1595_v12  ;;  %v1678_v56 = vadd.f32 %v4343_v51, %v1588_v47 }
 0x2e2   :  { %v1666_v60 = vpop.f32.mrf.mxu1 }
 0x2e3   :  { %v1683_v30 = vadd.f32 %v1666_v60, %v1593_v27 }
 0x2ec   :  { %v3655_v63 = vpop.f32.mrf.mxu1 }
 0x2ed   :  { %v1770_v1 = vadd.f32 %v3655_v63, %v1680_v62 }
 0x2ee   :  { %v1737_v4 = vpop.f32.mrf.mxu1 }
 0x2ef   :  { %v1785_v7 = vadd.f32 %v3338_v3, %v1770_v1  ;;  %v1768_v0 = vadd.f32 %v1737_v4, %v1678_v56  ;;  %v4004_v4 = vld [vmem:[%s4608_s5 + $0x8] sm:$0xff]  }
 0x2f0   :  { %v3656_v6 = vpop.f32.mrf.mxu1 }
 0x2f1   :  { %v1771_v8 = vadd.f32 %v3656_v6, %v1681_v5  ;;  %v1793_v18 = vmax.f32 %v1785_v7, 0.0  ;;  %v1783_v6 = vadd.f32 %v3338_v3, %v1768_v0  ;;  %v3997_v7 = vld [vmem:[%s4605_s2 + $0x10] sm:$0xff]  }
 0x2f2   :  { %v1740_v46 = vpop.f32.mrf.mxu1 }
 0x2f3   :  { %v1786_v10 = vadd.f32 %v3338_v3, %v1771_v8  ;;  %v1769_v36 = vadd.f32 %v1740_v46, %v1679_v48  ;;  %v1791_v42 = vmax.f32 %v1783_v6, 0.0  ;;  %v3998_v8 = vld [vmem:[%s4605_s2 + $0x18] sm:$0xff]   ;;  %v4012_v6 = vld [vmem:[%s4608_s5 + $0x40] sm:$0xff]  }
 0x2f5   :  { %v1794_v19 = vmax.f32 %v1786_v10, 0.0  ;;  %v1784_v44 = vadd.f32 %v3338_v3, %v1769_v36  ;;  %v3999_v10 = vld [vmem:[%s4605_s2 + $0x20] sm:$0xff]  }
 0x2f7   :  { %v1800_v23 = vpack.c.bf16 %v1794_v19, %v1793_v18  ;;  %v1792_v33 = vmax.f32 %v1784_v44, 0.0  ;;  %v4002_v18 = vld [vmem:[%s4605_s2 + $0x38] sm:$0xff]   ;;  %v4003_v19 = vld [vmem:[%s4605_s2 + $0x40] sm:$0xff]  }
 0x2f9   :  { %v1799_v51 = vpack.c.bf16 %v1792_v33, %v1791_v42 }
 0x2fc   :  { %v3659_v37 = vpop.f32.mrf.mxu1 }
 0x2fd   :  { %v1774_v34 = vadd.f32 %v3659_v37, %v1684_v50  ;;  %v4006_v50 = vld [vmem:[%s4608_s5 + $0x10] sm:$0xff]  }
 0x2fe   :  { %v1753_v14 = vpop.f32.mrf.mxu1 }
 0x2ff   :  { %v1789_v38 = vadd.f32 %v3338_v3, %v1774_v34  ;;  %v1772_v39 = vadd.f32 %v1753_v14, %v1682_v16  ;;  %v4007_v34 = vld [vmem:[%s4608_s5 + $0x18] sm:$0xff]  }
 0x300   :  { %v3660_v45 = vpop.f32.mrf.mxu1 }
 0x301   :  { %v1775_v54 = vadd.f32 %v3660_v45, %v1685_v28  ;;  %v1797_v25 = vmax.f32 %v1789_v38, 0.0  ;;  %v1787_v62 = vadd.f32 %v3338_v3, %v1772_v39 }
 0x302   :  { %v1756_v9 = vpop.f32.mrf.mxu1 }
 0x303   :  { %v1790_v61 = vadd.f32 %v3338_v3, %v1775_v54  ;;  %v1773_v40 = vadd.f32 %v1756_v9, %v1683_v30  ;;  %v1795_v1 = vmax.f32 %v1787_v62, 0.0 }
 0x305   :  { %v1798_v49 = vmax.f32 %v1790_v61, 0.0  ;;  %v1788_v55 = vadd.f32 %v3338_v3, %v1773_v40  ;;  %v3996_v3 = vld [vmem:[%s4605_s2 + $0x8] sm:$0xff]  }
 0x307   :  { %v1802_v63 = vpack.c.bf16 %v1798_v49, %v1797_v25  ;;  %v1796_v60 = vmax.f32 %v1788_v55, 0.0  ;;  %v4010_v25 = vld [vmem:[%s4608_s5 + $0x30] sm:$0xff]  }
 0x309   :  { %3662 = vmatpush3.bf16.msra.mxu1 %v1802_v63  ;;  %v1801_v5 = vpack.c.bf16 %v1796_v60, %v1795_v1  ;;  %v4011_v63 = vld [vmem:[%s4608_s5 + $0x38] sm:$0xff]  }
 0x30a   :  { %3663 = vmatprep.subr.bf16.mxu1 %v4087_v29 }
 0x30d   :  { %3664 = vmatpush3.bf16.msra.mxu1 %v1801_v5 }
 0x30e   :  { %3665 = vmatprep.subr.bf16.mxu1 %v4087_v29 }
 0x311   :  { %3666 = vmatpush3.bf16.msra.mxu1 %v1800_v23 }
 0x312   :  { %3667 = vmatprep.subr.bf16.mxu1 %v4087_v29 }
 0x315   :  { %3668 = vmatpush3.bf16.msra.mxu1 %v1799_v51 }
 0x316   :  { %3705 = vmatprep.subr.bf16.mxu1 %v4087_v29 }
 0x318   :  { %3670 = vmatmul.mubr.msk.bf16.vlgmr.msra.gmra.mxu1 %vm1866_vm3, %v3995_v53  ;;  %v4013_v53 = vld [vmem:[%s4609_s6 + $0x38] sm:$0xff]  }
 0x319   :  { %3673 = vmatprep.mubr.msk.bf16.mxu1 %vm4088_vm2, %v4087_v29  ;;  %3706 = vmatpush3.bf16.msra.mxu1 %v4004_v4  ;;  %v4019_v4 = vld [vmem:[%s4609_s6 + $0x30] sm:$0xff]  }
 0x31a   :  { %3711 = vmatprep.subr.bf16.mxu1 %v4087_v29  ;;  %3806 = vmatpush3.bf16.msra.mxu0 %v4013_v53  ;;  %v4015_v53 = vld [vmem:[#allocation4 + $0x8] sm:$0xff]  }
 0x31b   :  { %3807 = vmatprep.subr.bf16.mxu0 %v4087_v29 }
 0x31e   :  { %3808 = vmatpush3.bf16.msra.mxu0 %v4019_v4  ;;  %v4016_v4 = vld [vmem:[#allocation4 + $0x10] sm:$0xff]  }
 0x31f   :  { %3821 = vmatprep.subr.bf16.mxu0 %v4087_v29 }
 0x320   :  { %3674 = vmatmul.mubr.msk.bf16.gmra.mxu1 %vm1866_vm3, %v3996_v3 }
 0x321   :  { %3677 = vmatprep.mubr.msk.bf16.mxu1 %vm4088_vm2, %v4087_v29 }
 0x328   :  { %3678 = vmatmul.mubr.msk.bf16.gmra.mxu1 %vm1866_vm3, %v3997_v7 }
 0x329   :  { %3681 = vmatprep.mubr.msk.bf16.mxu1 %vm4088_vm2, %v4087_v29 }
 0x330   :  { %3682 = vmatmul.mubr.msk.bf16.gmra.mxu1 %vm1866_vm3, %v3998_v8 }
 0x331   :  { %3685 = vmatprep.mubr.msk.bf16.mxu1 %vm4088_vm2, %v4087_v29 }
 0x338   :  { %3686 = vmatmul.mubr.msk.bf16.gmra.mxu1 %vm1866_vm3, %v3999_v10 }
 0x339   :  { %3689 = vmatprep.mubr.msk.bf16.mxu1 %vm4088_vm2, %v4087_v29 }
 0x340   :  { %3690 = vmatmul.mubr.msk.bf16.gmra.mxu1 %vm1866_vm3, %v4000_v13 }
 0x341   :  { %3693 = vmatprep.mubr.msk.bf16.mxu1 %vm4088_vm2, %v4087_v29 }
 0x348   :  { %3694 = vmatmul.mubr.msk.bf16.gmra.mxu1 %vm1866_vm3, %v4001_v15 }
 0x349   :  { %3697 = vmatprep.mubr.msk.bf16.mxu1 %vm4088_vm2, %v4087_v29 }
 0x350   :  { %3698 = vmatmul.mubr.msk.bf16.gmra.mxu1 %vm1866_vm3, %v4002_v18 }
 0x351   :  { %3701 = vmatprep.mubr.msk.bf16.mxu1 %vm4088_vm2, %v4087_v29 }
 0x358   :  { %3702 = vmatmul.mubr.msk.bf16.gmra.mxu1 %vm1866_vm3, %v4003_v19 }
 0x359   :  { %3707 = vmatprep.mubr.msk.bf16.mxu1 %vm4088_vm2, %v4087_v29 }
 0x3d8   :  { %v1928_v20 = vpop.f32.mrf.mxu1 }
 0x3da   :  { %v3671_v21 = vpop.f32.mrf.mxu1 }
 0x3dc   :  { %v1931_v23 = vpop.f32.mrf.mxu1 }
 0x3dd   :  { %v1999_v2 = vpack.c.bf16 %v1931_v23, %v1928_v20 }
 0x3de   :  { %v3672_v24 = vpop.f32.mrf.mxu1 }
 0x3e0   :  { %v1936_v31 = vpop.f32.mrf.mxu1 }
 0x3e2   :  { %v3675_v32 = vpop.f32.mrf.mxu1 }
 0x3e4   :  { %v1939_v35 = vpop.f32.mrf.mxu1 }
 0x3e5   :  { %v2000_v22 = vpack.c.bf16 %v1939_v35, %v1936_v31 }
 0x3e6   :  { %v3676_v46 = vpop.f32.mrf.mxu1 }
 0x3e7   :  { %3708 = vmatmul.mubr.msk.bf16.vlgmr.msra.gmra.mxu1 %vm2019_vm4, %v2000_v22 }
 0x3e8   :  { %v1944_v11 = vpop.f32.mrf.mxu1  ;;  %3712 = vmatpush3.bf16.msra.mxu1 %v4005_v41  ;;  %3713 = vmatprep.mubr.msk.bf16.mxu1 %vm4088_vm2, %v4087_v29 }
 0x3e9   :  { %3717 = vmatprep.subr.bf16.mxu1 %v4087_v29 }
 0x3ea   :  { %v3679_v26 = vpop.f32.mrf.mxu1 }
 0x3ec   :  { %v1947_v43 = vpop.f32.mrf.mxu1 }
 0x3ed   :  { %v2001_v17 = vpack.c.bf16 %v1947_v43, %v1944_v11 }
 0x3ee   :  { %v3680_v37 = vpop.f32.mrf.mxu1 }
 0x3ef   :  { %3714 = vmatmul.mubr.msk.bf16.vlgmr.msra.gmra.mxu1 %vm2019_vm4, %v1999_v2 }
 0x3f0   :  { %v1952_v52 = vpop.f32.mrf.mxu1  ;;  %3718 = vmatpush3.bf16.msra.mxu1 %v4006_v50  ;;  %3719 = vmatprep.mubr.msk.bf16.mxu1 %vm4088_vm2, %v4087_v29 }
 0x3f1   :  { %3723 = vmatprep.subr.bf16.mxu1 %v4087_v29 }
 0x3f2   :  { %v3683_v57 = vpop.f32.mrf.mxu1 }
 0x3f4   :  { %v1955_v12 = vpop.f32.mrf.mxu1 }
 0x3f5   :  { %v2002_v45 = vpack.c.bf16 %v1955_v12, %v1952_v52 }
 0x3f6   :  { %v3684_v14 = vpop.f32.mrf.mxu1 }
 0x3f7   :  { %3720 = vmatmul.mubr.msk.bf16.vlgmr.msra.gmra.mxu1 %vm2019_vm4, %v2001_v17 }
 0x3f8   :  { %v1960_v27 = vpop.f32.mrf.mxu1  ;;  %3724 = vmatpush3.bf16.msra.mxu1 %v4007_v34  ;;  %3725 = vmatprep.mubr.msk.bf16.mxu1 %vm4088_vm2, %v4087_v29 }
 0x3f9   :  { %3729 = vmatprep.subr.bf16.mxu1 %v4087_v29 }
 0x3fa   :  { %v3687_v16 = vpop.f32.mrf.mxu1 }
 0x3fc   :  { %v1963_v28 = vpop.f32.mrf.mxu1 }
 0x3fd   :  { %v2003_v9 = vpack.c.bf16 %v1963_v28, %v1960_v27 }
 0x3fe   :  { %v3688_v30 = vpop.f32.mrf.mxu1 }
 0x3ff   :  { %3726 = vmatmul.mubr.msk.bf16.vlgmr.msra.gmra.mxu1 %vm2019_vm4, %v2002_v45 }
 0x400   :  { %v1968_v38 = vpop.f32.mrf.mxu1  ;;  %3730 = vmatpush3.bf16.msra.mxu1 %v4008_v58  ;;  %3731 = vmatprep.mubr.msk.bf16.mxu1 %vm4088_vm2, %v4087_v29 }
 0x401   :  { %3735 = vmatprep.subr.bf16.mxu1 %v4087_v29 }
 0x402   :  { %v3691_v39 = vpop.f32.mrf.mxu1 }
 0x404   :  { %v1971_v54 = vpop.f32.mrf.mxu1 }
 0x405   :  { %v2004_v62 = vpack.c.bf16 %v1971_v54, %v1968_v38 }
 0x406   :  { %v3692_v61 = vpop.f32.mrf.mxu1 }
 0x407   :  { %3732 = vmatmul.mubr.msk.bf16.vlgmr.msra.gmra.mxu1 %vm2019_vm4, %v2003_v9 }
 0x408   :  { %v1976_v40 = vpop.f32.mrf.mxu1  ;;  %3736 = vmatpush3.bf16.msra.mxu1 %v4009_v59  ;;  %3737 = vmatprep.mubr.msk.bf16.mxu1 %vm4088_vm2, %v4087_v29 }
 0x409   :  { %3741 = vmatprep.subr.bf16.mxu1 %v4087_v29 }
 0x40a   :  { %v3695_v47 = vpop.f32.mrf.mxu1 }
 0x40c   :  { %v1979_v48 = vpop.f32.mrf.mxu1 }
 0x40d   :  { %v2005_v60 = vpack.c.bf16 %v1979_v48, %v1976_v40 }
 0x40e   :  { %v3696_v49 = vpop.f32.mrf.mxu1 }
 0x40f   :  { %3738 = vmatmul.mubr.msk.bf16.vlgmr.msra.gmra.mxu1 %vm2019_vm4, %v2004_v62  ;;  %v3391_v49 = vld [vmem:[%s4611_s8] ss:$0 sm:$0xff] }
 0x410   :  { %v1984_v55 = vpop.f32.mrf.mxu1  ;;  %3742 = vmatpush3.bf16.msra.mxu1 %v4010_v25  ;;  %3743 = vmatprep.mubr.msk.bf16.mxu1 %vm4088_vm2, %v4087_v29 }
 0x411   :  { %3747 = vmatprep.subr.bf16.mxu1 %v4087_v29 }
 0x412   :  { %v3699_v56 = vpop.f32.mrf.mxu1 }
 0x414   :  { %v1987_v36 = vpop.f32.mrf.mxu1 }
 0x415   :  { %v2006_v33 = vpack.c.bf16 %v1987_v36, %v1984_v55 }
 0x416   :  { %v3700_v0 = vpop.f32.mrf.mxu1 }
 0x417   :  { %3744 = vmatmul.mubr.msk.bf16.vlgmr.msra.gmra.mxu1 %vm2019_vm4, %v2005_v60 }
 0x418   :  { %v1992_v1 = vpop.f32.mrf.mxu1  ;;  %3748 = vmatpush3.bf16.msra.mxu1 %v4011_v63  ;;  %3749 = vmatprep.mubr.msk.bf16.mxu1 %vm4088_vm2, %v4087_v29 }
 0x419   :  { %3753 = vmatprep.subr.bf16.mxu1 %v4087_v29 }
 0x41a   :  { %v3703_v44 = vpop.f32.mrf.mxu1 }
 0x41c   :  { %v1995_v5 = vpop.f32.mrf.mxu1 }
 0x41d   :  { %v2007_v51 = vpack.c.bf16 %v1995_v5, %v1992_v1 }
 0x41e   :  { %v3704_v42 = vpop.f32.mrf.mxu1 }
 0x41f   :  { %3750 = vmatmul.mubr.msk.bf16.vlgmr.msra.gmra.mxu1 %vm2019_vm4, %v2006_v33  ;;  %v4014_v33 = vld [vmem:[#allocation4] sm:$0xff]   ;;  %v4020_v42 = vld [vmem:[%s4609_s6 + $0x18] sm:$0xff]  }
 0x420   :  { %3754 = vmatpush3.bf16.msra.mxu1 %v4012_v6  ;;  %3755 = vmatprep.mubr.msk.bf16.mxu1 %vm4088_vm2, %v4087_v29 }
 0x421   :  { %3759 = vmatprep.subr.bf16.mxu1 %v4087_v29 }
 0x427   :  { %3756 = vmatmul.mubr.msk.bf16.vlgmr.msra.gmra.mxu1 %vm2019_vm4, %v2007_v51  ;;  %v4021_v51 = vld [vmem:[%s4609_s6 + $0x10] sm:$0xff]  }
 0x428   :  { %3761 = vmatprep.mubr.msk.bf16.mxu1 %vm4088_vm2, %v4087_v29 }
 0x4a7   :  { %v2057_v3 = vpop.f32.mrf.mxu1 }
 0x4a9   :  { %v3709_v7 = vpop.f32.mrf.mxu1 }
 0x4aa   :  { %v4018_v7 = vld [vmem:[#allocation4 + $0x20] ss:$0 sps:$4 sm:$0xff]  }
 0x4ab   :  { %v2060_v8 = vpop.f32.mrf.mxu1 }
 0x4ad   :  { %v3710_v10 = vpop.f32.mrf.mxu1 }
 0x4af   :  { %v2107_v13 = vpop.f32.mrf.mxu1 }
 0x4b0   :  { %v2108_v12 = vadd.f32 %v2107_v13, %v2057_v3  ;;  %v4017_v3 = vld [vmem:[#allocation4 + $0x18] sm:$0xff]  }
 0x4b1   :  { %v3715_v15 = vpop.f32.mrf.mxu1 }
 0x4b3   :  { %v2110_v18 = vpop.f32.mrf.mxu1 }
 0x4b4   :  { %v2111_v27 = vadd.f32 %v2110_v18, %v2060_v8 }
 0x4b5   :  { %v3716_v19 = vpop.f32.mrf.mxu1 }
 0x4b6   :  { %v4022_v19 = vld [vmem:[%s4609_s6 + $0x8] sm:$0xff]  }
 0x4b7   :  { %v2160_v20 = vpop.f32.mrf.mxu1 }
 0x4b8   :  { %v2167_v17 = vadd.f32 %v2160_v20, %v2108_v12  ;;  %v4030_v12 = vld [vmem:[%s4609_s6 + $0x78] sm:$0xff]  }
 0x4b9   :  { %v3721_v21 = vpop.f32.mrf.mxu1 }
 0x4bb   :  { %v2163_v23 = vpop.f32.mrf.mxu1 }
 0x4bc   :  { %v2168_v58 = vadd.f32 %v2163_v23, %v2111_v27  ;;  %v4023_v23 = vld [vmem:[%s4609_s6] sm:$0xff]  }
 0x4bd   :  { %v3722_v24 = vpop.f32.mrf.mxu1 }
 0x4bf   :  { %v2215_v31 = vpop.f32.mrf.mxu1 }
 0x4c0   :  { %v2222_v16 = vadd.f32 %v2215_v31, %v2167_v17 }
 0x4c1   :  { %v3727_v32 = vpop.f32.mrf.mxu1 }
 0x4c3   :  { %v2218_v35 = vpop.f32.mrf.mxu1 }
 0x4c4   :  { %v2223_v38 = vadd.f32 %v2218_v35, %v2168_v58  ;;  %v4024_v35 = vld [vmem:[%s4609_s6 + $0x28] sm:$0xff]  }
 0x4c5   :  { %v3728_v41 = vpop.f32.mrf.mxu1 }
 0x4c7   :  { %v2270_v22 = vpop.f32.mrf.mxu1 }
 0x4c8   :  { %v2277_v45 = vadd.f32 %v2270_v22, %v2222_v16  ;;  %v4026_v22 = vld [vmem:[%s4609_s6 + $0x58] sm:$0xff]   ;;  %v4032_v16 = vld [vmem:[%s4609_s6 + $0x70] sm:$0xff]  }
 0x4c9   :  { %v3733_v46 = vpop.f32.mrf.mxu1 }
 0x4cb   :  { %v2273_v11 = vpop.f32.mrf.mxu1 }
 0x4cc   :  { %v2278_v59 = vadd.f32 %v2273_v11, %v2223_v38 }
 0x4cd   :  { %v3734_v26 = vpop.f32.mrf.mxu1 }
 0x4ce   :  { %v4025_v26 = vld [vmem:[%s4609_s6 + $0x20] sm:$0xff]  }
 0x4cf   :  { %v2325_v43 = vpop.f32.mrf.mxu1 }
 0x4d0   :  { %v2332_v39 = vadd.f32 %v2325_v43, %v2277_v45  ;;  %v4031_v45 = vld [vmem:[%s4609_s6 + $0x68] sm:$0xff]  }
 0x4d1   :  { %v3739_v50 = vpop.f32.mrf.mxu1 }
 0x4d2   :  { %v4028_v50 = vld [vmem:[%s4609_s6 + $0x50] sm:$0xff]  }
 0x4d3   :  { %v2328_v2 = vpop.f32.mrf.mxu1 }
 0x4d4   :  { %v2333_v40 = vadd.f32 %v2328_v2, %v2278_v59 }
 0x4d5   :  { %v3740_v37 = vpop.f32.mrf.mxu1 }
 0x4d7   :  { %v2380_v52 = vpop.f32.mrf.mxu1 }
 0x4d8   :  { %v2387_v9 = vadd.f32 %v2380_v52, %v2332_v39  ;;  %v4027_v52 = vld [vmem:[%s4609_s6 + $0x48] sm:$0xff]  }
 0x4d9   :  { %v3745_v57 = vpop.f32.mrf.mxu1 }
 0x4db   :  { %v2383_v34 = vpop.f32.mrf.mxu1 }
 0x4dc   :  { %v2388_v25 = vadd.f32 %v2383_v34, %v2333_v40 }
 0x4dd   :  { %v3746_v14 = vpop.f32.mrf.mxu1 }
 0x4de   :  { %v4029_v14 = vld [vmem:[%s4609_s6 + $0x40] sm:$0xff]  }
 0x4df   :  { %v2435_v28 = vpop.f32.mrf.mxu1 }
 0x4e0   :  { %v2442_v47 = vadd.f32 %v2435_v28, %v2387_v9 }
 0x4e1   :  { %v3751_v30 = vpop.f32.mrf.mxu1 }
 0x4e3   :  { %v2438_v54 = vpop.f32.mrf.mxu1 }
 0x4e4   :  { %v2443_v56 = vadd.f32 %v2438_v54, %v2388_v25  ;;  %v4033_v54 = vld [vmem:[%s4609_s6 + $0x60] sm:$0xff]  }
 0x4e5   :  { %v3752_v61 = vpop.f32.mrf.mxu1 }
 0x4e6   :  { %v4034_v61 = vld [vmem:[%s4609_s6 + $0x88] sm:$0xff]  }
 0x4e7   :  { %v2490_v48 = vpop.f32.mrf.mxu1 }
 0x4e8   :  { %v2497_v62 = vadd.f32 %v2490_v48, %v2442_v47  ;;  %v4035_v47 = vld [vmem:[%s4609_s6 + $0x80] sm:$0xff]  }
 0x4e9   :  { %v3757_v55 = vpop.f32.mrf.mxu1 }
 0x4ea   :  { %v2506_v63 = vadd.f32 %v3391_v49, %v2497_v62 }
 0x4eb   :  { %v2493_v36 = vpop.f32.mrf.mxu1 }
 0x4ec   :  { %v2498_v60 = vadd.f32 %v2493_v36, %v2443_v56  ;;  %v2508_v44 = vmax.f32 %v2506_v63, 0.0 }
 0x4ed   :  { %v3758_v0 = vpop.f32.mrf.mxu1 }
 0x4ee   :  { %v2507_v1 = vadd.f32 %v3391_v49, %v2498_v60 }
 0x4f0   :  { %v2509_v5 = vmax.f32 %v2507_v1, 0.0 }
 0x4f2   :  { %v2510_v6 = vpack.c.bf16 %v2509_v5, %v2508_v44 }
 0x4f4   :  { %3760 = vmatpush3.bf16.msra.mxu1 %v2510_v6 }
 0x4f5   :  { %3781 = vmatprep.subr.bf16.mxu1 %v4087_v29 }
 0x4f7   :  { %3762 = vmatmul.mubr.msk.bf16.vlgmr.msra.gmra.mxu1 %vm2019_vm4, %v4014_v33 }
 0x4f8   :  { %3765 = vmatprep.mubr.msk.bf16.mxu1 %vm4088_vm2, %v4087_v29  ;;  %3782 = vmatpush3.bf16.msra.mxu1 %v4020_v42 }
 0x4f9   :  { %3783 = vmatprep.subr.bf16.mxu1 %v4087_v29 }
 0x4fc   :  { %3784 = vmatpush3.bf16.msra.mxu1 %v4021_v51 }
 0x4fd   :  { %3789 = vmatprep.subr.bf16.mxu1 %v4087_v29 }
 0x4ff   :  { %3766 = vmatmul.mubr.msk.bf16.gmra.mxu1 %vm2019_vm4, %v4015_v53 }
 0x500   :  { %3769 = vmatprep.mubr.msk.bf16.mxu1 %vm4088_vm2, %v4087_v29 }
 0x507   :  { %3770 = vmatmul.mubr.msk.bf16.gmra.mxu1 %vm2019_vm4, %v4016_v4 }
 0x508   :  { %3773 = vmatprep.mubr.msk.bf16.mxu1 %vm4088_vm2, %v4087_v29 }
 0x50f   :  { %3774 = vmatmul.mubr.msk.bf16.gmra.mxu1 %vm2019_vm4, %v4017_v3 }
 0x510   :  { %3777 = vmatprep.mubr.msk.bf16.mxu1 %vm4088_vm2, %v4087_v29 }
 0x517   :  { %3778 = vmatmul.mubr.msk.bf16.gmra.mxu1 %vm2019_vm4, %v4018_v7 }
 0x518   :  { %3785 = vmatprep.mubr.msk.bf16.mxu1 %vm4088_vm2, %v4087_v29 }
 0x5b7   :  { %v2592_v8 = vpop.f32.mrf.mxu1 }
 0x5b9   :  { %v3763_v10 = vpop.f32.mrf.mxu1 }
 0x5bb   :  { %v2595_v13 = vpop.f32.mrf.mxu1 }
 0x5bc   :  { %v2630_v15 = vpack.c.bf16 %v2595_v13, %v2592_v8 }
 0x5bd   :  { %v3764_v18 = vpop.f32.mrf.mxu1 }
 0x5be   :  { %v2645_v20 = vrot.slane %v2630_v15, 4 }
 0x5bf   :  { %v2600_v21 = vpop.f32.mrf.mxu1 }
 0x5c0   :  { %3786 = vmatmul.mubr.msk.bf16.vlgmr.msra.gmra.mxu1 %vm2658_vm5, %v2645_v20 }
 0x5c1   :  { %3790 = vmatpush3.bf16.msra.mxu1 %v4022_v19  ;;  %v3767_v24 = vpop.f32.mrf.mxu1  ;;  %3793 = vmatprep.mubr.msk.bf16.mxu1 %vm4088_vm2, %v4087_v29 }
 0x5c2   :  { %3791 = vmatprep.subr.bf16.mxu1 %v4087_v29 }
 0x5c3   :  { %v2603_v31 = vpop.f32.mrf.mxu1 }
 0x5c4   :  { %v2631_v32 = vpack.c.bf16 %v2603_v31, %v2600_v21 }
 0x5c5   :  { %3792 = vmatpush3.bf16.msra.mxu1 %v4023_v23  ;;  %v3768_v41 = vpop.f32.mrf.mxu1 }
 0x5c6   :  { %v2824_v46 = vrot.slane %v2631_v32, 4  ;;  %3797 = vmatprep.subr.bf16.mxu1 %v4087_v29 }
 0x5c7   :  { %v2608_v11 = vpop.f32.mrf.mxu1 }
 0x5c8   :  { %3794 = vmatmul.mubr.msk.bf16.vlgmr.msra.gmra.mxu1 %vm2658_vm5, %v2630_v15  ;;  %3810 = vmatmul.mubr.msk.bf16.vlgmr.msra.gmra.mxu0 %vm2658_vm5, %v2824_v46 }
 0x5c9   :  { %3798 = vmatpush3.bf16.msra.mxu1 %v4024_v35  ;;  %v3771_v43 = vpop.f32.mrf.mxu1  ;;  %3822 = vmatpush3.bf16.msra.mxu0 %v4026_v22 }
 0x5ca   :  { %3799 = vmatprep.subr.bf16.mxu1 %v4087_v29  ;;  %3801 = vmatprep.mubr.msk.bf16.mxu1 %vm4088_vm2, %v4087_v29 }
 0x5cb   :  { %v2611_v2 = vpop.f32.mrf.mxu1  ;;  %3823 = vmatprep.subr.bf16.mxu0 %v4087_v29  ;;  %3825 = vmatprep.mubr.msk.bf16.mxu0 %vm4088_vm2, %v4087_v29 }
 0x5cc   :  { %v2632_v37 = vpack.c.bf16 %v2611_v2, %v2608_v11 }
 0x5cd   :  { %3800 = vmatpush3.bf16.msra.mxu1 %v4025_v26  ;;  %v3772_v57 = vpop.f32.mrf.mxu1  ;;  %3824 = vmatpush3.bf16.msra.mxu0 %v4028_v50  ;;  %v3461_v50 = vld [vmem:[%s4612_s9] ss:$0 sm:$0xff] }
 0x5ce   :  { %v2948_v34 = vrot.slane %v2632_v37, 4  ;;  %3813 = vmatprep.subr.bf16.mxu1 %v4087_v29  ;;  %3837 = vmatprep.subr.bf16.mxu0 %v4087_v29 }
 0x5cf   :  { %v2616_v17 = vpop.f32.mrf.mxu1 }
 0x5d0   :  { %3802 = vmatmul.mubr.msk.bf16.vlgmr.msra.gmra.mxu1 %vm2658_vm5, %v2631_v32  ;;  %3826 = vmatmul.mubr.msk.bf16.vlgmr.msra.gmra.mxu0 %vm2658_vm5, %v2948_v34 }
 0x5d1   :  { %3814 = vmatpush3.bf16.msra.mxu1 %v4027_v52  ;;  %v3775_v27 = vpop.f32.mrf.mxu1  ;;  %3838 = vmatpush3.bf16.msra.mxu0 %v4030_v12 }
 0x5d2   :  { %3815 = vmatprep.subr.bf16.mxu1 %v4087_v29  ;;  %3817 = vmatprep.mubr.msk.bf16.mxu1 %vm4088_vm2, %v4087_v29 }
 0x5d3   :  { %v2619_v28 = vpop.f32.mrf.mxu1  ;;  %3839 = vmatprep.subr.bf16.mxu0 %v4087_v29  ;;  %3841 = vmatprep.mubr.msk.bf16.mxu0 %vm4088_vm2, %v4087_v29 }
 0x5d4   :  { %v2633_v58 = vpack.c.bf16 %v2619_v28, %v2616_v17 }
 0x5d5   :  { %3816 = vmatpush3.bf16.msra.mxu1 %v4029_v14  ;;  %3840 = vmatpush3.bf16.msra.mxu0 %v4032_v16  ;;  %v3776_v30 = vpop.f32.mrf.mxu1 }
 0x5d6   :  { %v3072_v38 = vrot.slane %v2633_v58, 4  ;;  %3829 = vmatprep.subr.bf16.mxu1 %v4087_v29 }
 0x5d7   :  { %v2624_v39 = vpop.f32.mrf.mxu1 }
 0x5d8   :  { %3818 = vmatmul.mubr.msk.bf16.vlgmr.msra.gmra.mxu1 %vm2658_vm5, %v2632_v37  ;;  %3842 = vmatmul.mubr.msk.bf16.vlgmr.msra.gmra.mxu0 %vm2658_vm5, %v3072_v38  ;;  %v2634_v48 = vpack.c.bf16 %v2624_v39, %v2624_v39 }
 0x5d9   :  { %3830 = vmatpush3.bf16.msra.mxu1 %v4031_v45  ;;  %3833 = vmatprep.mubr.msk.bf16.mxu1 %vm4088_vm2, %v4087_v29  ;;  %v3779_v59 = vpop.f32.mrf.mxu1 }
 0x5da   :  { %3831 = vmatprep.subr.bf16.mxu1 %v4087_v29 }
 0x5db   :  { %v2627_v9 = vpop.f32.mrf.mxu1 }
 0x5dd   :  { %3832 = vmatpush3.bf16.msra.mxu1 %v4033_v54  ;;  %v3780_v40 = vpop.f32.mrf.mxu1 }
 0x5de   :  { %3845 = vmatprep.subr.bf16.mxu1 %v4087_v29 }
 0x5e0   :  { %3834 = vmatmul.mubr.msk.bf16.vlgmr.msra.gmra.mxu1 %vm2658_vm5, %v2633_v58 }
 0x5e1   :  { %3846 = vmatpush3.bf16.msra.mxu1 %v4034_v61  ;;  %3849 = vmatprep.mubr.msk.bf16.mxu1 %vm4088_vm2, %v4087_v29 }
 0x5e2   :  { %3847 = vmatprep.subr.bf16.mxu1 %v4087_v29 }
 0x5e5   :  { %3848 = vmatpush3.bf16.msra.mxu1 %v4035_v47 }
 0x5e8   :  { %3850 = vmatmul.mubr.msk.bf16.vlgmr.msra.gmra.mxu1 %vm2658_vm5, %v2634_v48 }
 0x680   :  { %v2696_v25 = vpop.f32.mrf.mxu1 }
 0x682   :  { %v3787_v62 = vpop.f32.mrf.mxu1 }
 0x684   :  { %v2699_v49 = vpop.f32.mrf.mxu1 }
 0x686   :  { %v3788_v55 = vpop.f32.mrf.mxu1 }
 0x688   :  { %v2751_v56 = vpop.f32.mrf.mxu1  ;;  %v2874_v36 = vpop.f32.mrf.mxu0 }
 0x689   :  { %v2752_v4 = vadd.f32 %v2751_v56, %v2696_v25 }
 0x68a   :  { %v3795_v63 = vpop.f32.mrf.mxu1  ;;  %v3811_v60 = vpop.f32.mrf.mxu0 }
 0x68c   :  { %v2754_v0 = vpop.f32.mrf.mxu1  ;;  %v2877_v1 = vpop.f32.mrf.mxu0 }
 0x68e   :  { %v3796_v44 = vpop.f32.mrf.mxu1  ;;  %v3812_v5 = vpop.f32.mrf.mxu0 }
 0x690   :  { %v2811_v6 = vpop.f32.mrf.mxu1  ;;  %v2998_v33 = vpop.f32.mrf.mxu0 }
 0x691   :  { %v2817_v8 = vadd.f32 %v2811_v6, %v2752_v4 }
 0x692   :  { %v3803_v42 = vpop.f32.mrf.mxu1  ;;  %v3827_v29 = vpop.f32.mrf.mxu0 }
 0x693   :  { %v2880_v19 = vadd.f32 %v2874_v36, %v2817_v8 }
 0x694   :  { %v2814_v51 = vpop.f32.mrf.mxu1  ;;  %v3001_v53 = vpop.f32.mrf.mxu0 }
 0x696   :  { %v3804_v3 = vpop.f32.mrf.mxu1  ;;  %v3828_v7 = vpop.f32.mrf.mxu0 }
 0x698   :  { %v2935_v10 = vpop.f32.mrf.mxu1  ;;  %v3122_v13 = vpop.f32.mrf.mxu0 }
 0x699   :  { %v2941_v23 = vadd.f32 %v2935_v10, %v2880_v19 }
 0x69a   :  { %v3819_v15 = vpop.f32.mrf.mxu1  ;;  %v3843_v18 = vpop.f32.mrf.mxu0 }
 0x69b   :  { %v3004_v35 = vadd.f32 %v2998_v33, %v2941_v23 }
 0x69c   :  { %v2938_v20 = vpop.f32.mrf.mxu1  ;;  %v3125_v21 = vpop.f32.mrf.mxu0 }
 0x69e   :  { %v3820_v24 = vpop.f32.mrf.mxu1  ;;  %v3844_v31 = vpop.f32.mrf.mxu0 }
 0x6a0   :  { %v3059_v32 = vpop.f32.mrf.mxu1 }
 0x6a1   :  { %v3065_v22 = vadd.f32 %v3059_v32, %v3004_v35 }
 0x6a2   :  { %v3835_v41 = vpop.f32.mrf.mxu1 }
 0x6a3   :  { %v3128_v26 = vadd.f32 %v3122_v13, %v3065_v22 }
 0x6a4   :  { %v3062_v46 = vpop.f32.mrf.mxu1 }
 0x6a6   :  { %v3836_v11 = vpop.f32.mrf.mxu1 }
 0x6a8   :  { %v3183_v43 = vpop.f32.mrf.mxu1 }
 0x6a9   :  { %v3189_v2 = vadd.f32 %v3183_v43, %v3128_v26 }
 0x6aa   :  { %v3851_v37 = vpop.f32.mrf.mxu1 }
 0x6ab   :  { %v3197_v52 = vadd.f32 %v3461_v50, %v3189_v2 }
 0x6ac   :  { %v3186_v57 = vpop.f32.mrf.mxu1 }
 0x6ad   :  { %v3198_v12 = vmax.f32 %v3197_v52, 0.0 }
 0x6ae   :  { %v3852_v34 = vpop.f32.mrf.mxu1 }
 0x6af   :  { %3199 = vst [vmem:[%s4613_s10] sm:$0xff] %v3198_v12 }
 0x6b0   :  { %3204 = vsyncpa [#allocation3], 1 }
 0x6b1   :  { %3205 = vsyncpa [#allocation5], 1 }

</bundles_post_ra>
